<compile_context>
chip_gen: v7x
topology: tpu7x:2x2x1
jax: 0.10.0
libtpu: 0.0.40
codegen_flags: <defaults>
</compile_context>

<pallas_src>
import jax
import jax.numpy as jnp
from jax.experimental import pallas as pl
from jax.experimental.pallas import tpu as pltpu

EPS = 1e-5  # nn.BatchNorm2d default


def _round_up(v, m):
    return (v + m - 1) // m * m


# --------------------------------------------------------------------------- #
# pass 1: conv1 (3x3 stride s) + 1x1 shortcut + BN1/BN3 partial stats
# --------------------------------------------------------------------------- #
def _make_conv1_kernel(s, Ho, Wo, Wp, Cout):
    L = Ho * Wp          # "wide" GEMM rows (valid columns [0, Wo) per row)
    HW = Ho * Wo

    def kernel(x_ref, w1_ref, w3_ref, y1_ref, y3_ref, st1_ref, st3_ref):
        # x_ref : (1, s*s, Npix, Cin)  flattened space-to-depth phases
        # w1_ref: (9, Cin, Cout)       w3_ref: (Cin, Cout)
        acc1 = None
        for kh in range(3):
            for kw in range(3):
                p = (kh % s) * s + (kw % s)
                r0 = (kh // s) * Wp + (kw // s)         # static flat-row offset
                d = jnp.dot(x_ref[0, p, r0:r0 + L, :], w1_ref[kh * 3 + kw],
                            preferred_element_type=jnp.float32)
                acc1 = d if acc1 is None else acc1 + d

        psc = (1 % s) * s + (1 % s)                     # 1x1 stride-s shortcut
        rsc = (1 // s) * Wp + (1 // s)
        acc3 = jnp.dot(x_ref[0, psc, rsc:rsc + L, :], w3_ref[...],
                       preferred_element_type=jnp.float32)

        # drop the wrapped/garbage columns ONCE (instead of 9 per-tap copies)
        v1 = acc1.reshape(Ho, Wp, Cout)[:, :Wo, :].reshape(HW, Cout)
        v3 = acc3.reshape(Ho, Wp, Cout)[:, :Wo, :].reshape(HW, Cout)

        y1_ref[0] = v1.astype(y1_ref.dtype)
        y3_ref[0] = v3.astype(y3_ref.dtype)
        # BN partial statistics from the f32 accumulators: [sum ; sum_sq]
        st1_ref[0, 0:1, :] = jnp.sum(v1, axis=0, keepdims=True)
        st1_ref[0, 1:2, :] = jnp.sum(v1 * v1, axis=0, keepdims=True)
        st3_ref[0, 0:1, :] = jnp.sum(v3, axis=0, keepdims=True)
        st3_ref[0, 1:2, :] = jnp.sum(v3 * v3, axis=0, keepdims=True)

    return kernel


# --------------------------------------------------------------------------- #
# pass 2: BN1 affine + ReLU, conv2 (3x3 pad 1) + BN2 partial stats
# --------------------------------------------------------------------------- #
def _make_conv2_kernel(Ho, Wo, Cout, Npad, cdt):
    Wp = Wo + 2
    L = Ho * Wp
    HW = Ho * Wo

    def kernel(y1_ref, aff1_ref, w2_ref, y2_ref, st2_ref, pad_ref):
        # fused BN1 affine + ReLU in f32, rounded to compute dtype for the MXU
        a1 = aff1_ref[0:1, :]
        c1 = aff1_ref[1:2, :]
        z = jnp.maximum(y1_ref[0].astype(jnp.float32) * a1 + c1, 0.0).astype(cdt)

        # conv2 zero padding in a flat (Npad, Cout) scratch:
        #   top border + bottom border/extra rows -> two full-width zero stores
        #   left/right pad columns                -> widened in-register, 1 store
        pad_ref[0:Wp, :] = jnp.zeros((Wp, Cout), cdt)
        pad_ref[(Ho + 1) * Wp:Npad, :] = jnp.zeros((Npad - (Ho + 1) * Wp, Cout), cdt)
        zc = jnp.zeros((Ho, 1, Cout), cdt)
        z_wide = jnp.concatenate([zc, z.reshape(Ho, Wo, Cout), zc], axis=1)
        pad_ref[Wp:(Ho + 1) * Wp, :] = z_wide.reshape(L, Cout)

        acc = None
        for kh in range(3):
            for kw in range(3):
                r0 = kh * Wp + kw                        # static flat-row offset
                d = jnp.dot(pad_ref[r0:r0 + L, :], w2_ref[kh * 3 + kw],
                            preferred_element_type=jnp.float32)
                acc = d if acc is None else acc + d

        v = acc.reshape(Ho, Wp, Cout)[:, :Wo, :].reshape(HW, Cout)
        y2_ref[0] = v.astype(y2_ref.dtype)
        st2_ref[0, 0:1, :] = jnp.sum(v, axis=0, keepdims=True)
        st2_ref[0, 1:2, :] = jnp.sum(v * v, axis=0, keepdims=True)

    return kernel


# --------------------------------------------------------------------------- #
# pass 3: BN2 affine + BN3 affine + residual add + ReLU (lane-dense layout)
# --------------------------------------------------------------------------- #
def _finalize_kernel(y2_ref, y3_ref, aff_ref, o_ref):
    # y2_ref / y3_ref: (1, Ho, Wo*Cout);  aff_ref: (3, Wo*Cout) = [a2; a3; c2+c3]
    a2 = aff_ref[0:1, :]
    a3 = aff_ref[1:2, :]
    c23 = aff_ref[2:3, :]
    y2 = y2_ref[0].astype(jnp.float32)
    y3 = y3_ref[0].astype(jnp.float32)
    o_ref[0] = jnp.maximum(y2 * a2 + y3 * a3 + c23, 0.0).astype(o_ref.dtype)


# --------------------------------------------------------------------------- #
# wrapper
# --------------------------------------------------------------------------- #
def resblock_forward(x_nchw, params, stride, *, use_bf16=True):
    """Pallas ResBlock forward. x_nchw: (N, Cin, H, W) f32 -> (N, Cout, Ho, Wo)."""
    N, Cin, H, W = x_nchw.shape
    Cout = params["w1"].shape[-1]
    s = int(stride)
    Ho = (H + 2 - 3) // s + 1
    Wo = (W + 2 - 3) // s + 1
    HW = Ho * Wo
    M = N * HW
    f32 = jnp.float32
    cdt = jnp.bfloat16 if use_bf16 else jnp.float32
    bpe = jnp.dtype(cdt).itemsize

    x = jnp.transpose(x_nchw, (0, 2, 3, 1)).astype(f32)          # NCHW -> NHWC

    # ---- space-to-depth of the zero-padded input, flattened per phase -------
    # phase (dh, dw) holds x_pad[dh::s, dw::s]; every conv1 / shortcut tap is a
    # contiguous static row-window of the flat (Hp*Wp + extra, Cin) phase.
    off = 2 // s
    Hp1, Wp1 = Ho + off, Wo + off
    ph = max(0, Hp1 * s - (H + 2))
    pw = max(0, Wp1 * s - (W + 2))
    xp = jnp.pad(x, ((0, 0), (1, 1 + ph), (1, 1 + pw), (0, 0)))
    xs2d = (xp.reshape(N, Hp1, s, Wp1, s, Cin)
              .transpose(0, 2, 4, 1, 3, 5)
              .reshape(N, s * s, Hp1 * Wp1, Cin))
    Npix1 = _round_up(Hp1 * Wp1 + off, 8)       # tail rows keep windows in-bounds
    xs2d = jnp.pad(xs2d, ((0, 0), (0, 0), (0, Npix1 - Hp1 * Wp1), (0, 0))).astype(cdt)

    # weights, tap-major; conv biases dropped: a bias immediately followed by
    # training-mode BN is exactly cancelled by the batch-mean subtraction.
    w1r = params["w1"].astype(cdt).reshape(9, Cin, Cout)
    w2r = params["w2"].astype(cdt).reshape(9, Cout, Cout)
    w3r = params["w3"].astype(cdt)

    cparams = pltpu.CompilerParams(
        dimension_semantics=("parallel",),       # shard batch across TensorCores
        vmem_limit_bytes=32 * 1024 * 1024)       # raise on v6e for large maps

    ce1 = pl.CostEstimate(
        flops=2 * N * Ho * Wp1 * Cin * Cout * 10, transcendentals=0,
        bytes_accessed=(N * s * s * Npix1 * Cin + 10 * Cin * Cout
                        + 2 * N * HW * Cout) * bpe + 4 * N * 2 * Cout * 4)

    # ---- pass 1 --------------------------------------------------------------
    y1, y3, st1, st3 = pl.pallas_call(
        _make_conv1_kernel(s, Ho, Wo, Wp1, Cout),
        grid=(N,),
        in_specs=[
            pl.BlockSpec((1, s * s, Npix1, Cin), lambda n: (n, 0, 0, 0)),
            pl.BlockSpec((9, Cin, Cout), lambda n: (0, 0, 0)),    # resident
            pl.BlockSpec((Cin, Cout), lambda n: (0, 0)),          # resident
        ],
        out_specs=[
            pl.BlockSpec((1, HW, Cout), lambda n: (n, 0, 0)),
            pl.BlockSpec((1, HW, Cout), lambda n: (n, 0, 0)),
            pl.BlockSpec((1, 2, Cout), lambda n: (n, 0, 0)),
            pl.BlockSpec((1, 2, Cout), lambda n: (n, 0, 0)),
        ],
        out_shape=(
            jax.ShapeDtypeStruct((N, HW, Cout), cdt),
            jax.ShapeDtypeStruct((N, HW, Cout), cdt),
            jax.ShapeDtypeStruct((N, 2, Cout), f32),
            jax.ShapeDtypeStruct((N, 2, Cout), f32),
        ),
        compiler_params=cparams,
        cost_estimate=ce1,
    )(xs2d, w1r, w3r)

    def bn_affine(stats, g, be):
        # TODO(synk): E[x^2]-E[x]^2 in f32 can cancel for large-mean activations;
        # switch to shifted sums / Welford merge for production data.
        ssum = jnp.sum(stats[:, 0, :], axis=0)
        sqsum = jnp.sum(stats[:, 1, :], axis=0)
        mu = ssum / M
        var = sqsum / M - mu * mu                # biased batch variance
        a = g.astype(f32) * jax.lax.rsqrt(var + EPS)
        return jnp.stack([a, be.astype(f32) - mu * a], axis=0)   # (2, Cout)

    ac1 = bn_affine(st1, params["g1"], params["be1"])
    ac3 = bn_affine(st3, params["g3"], params["be3"])

    # ---- pass 2 --------------------------------------------------------------
    Wp2 = Wo + 2
    Npad2 = _round_up((Ho + 2) * Wp2 + 2, 8)
    ce2 = pl.CostEstimate(
        flops=2 * N * Ho * Wp2 * Cout * Cout * 9, transcendentals=0,
        bytes_accessed=(2 * N * HW * Cout + 9 * Cout * Cout) * bpe
        + (2 * Cout + N * 2 * Cout) * 4)

    y2, st2 = pl.pallas_call(
        _make_conv2_kernel(Ho, Wo, Cout, Npad2, cdt),
        grid=(N,),
        in_specs=[
            pl.BlockSpec((1, HW, Cout), lambda n: (n, 0, 0)),
            pl.BlockSpec((2, Cout), lambda n: (0, 0)),            # resident affine
            pl.BlockSpec((9, Cout, Cout), lambda n: (0, 0, 0)),   # resident weights
        ],
        out_specs=[
            pl.BlockSpec((1, HW, Cout), lambda n: (n, 0, 0)),
            pl.BlockSpec((1, 2, Cout), lambda n: (n, 0, 0)),
        ],
        out_shape=(
            jax.ShapeDtypeStruct((N, HW, Cout), cdt),
            jax.ShapeDtypeStruct((N, 2, Cout), f32),
        ),
        scratch_shapes=[pltpu.VMEM((Npad2, Cout), cdt)],
        compiler_params=cparams,
        cost_estimate=ce2,
    )(y1, ac1, w2r)

    ac2 = bn_affine(st2, params["g2"], params["be2"])

    # ---- pass 3: lane-dense elementwise finalize -----------------------------
    WoC = Wo * Cout
    aff = jnp.stack([jnp.tile(ac2[0], Wo),
                     jnp.tile(ac3[0], Wo),
                     jnp.tile(ac2[1] + ac3[1], Wo)], axis=0)       # (3, Wo*Cout)
    y2w = y2.reshape(N, Ho, WoC)
    y3w = y3.reshape(N, Ho, WoC)
    ce3 = pl.CostEstimate(
        flops=5 * N * HW * Cout, transcendentals=0,
        bytes_accessed=2 * N * HW * Cout * bpe + N * HW * Cout * 4 + 3 * WoC * 4)

    out = pl.pallas_call(
        _finalize_kernel,
        grid=(N,),
        in_specs=[
            pl.BlockSpec((1, Ho, WoC), lambda n: (n, 0, 0)),
            pl.BlockSpec((1, Ho, WoC), lambda n: (n, 0, 0)),
            pl.BlockSpec((3, WoC), lambda n: (0, 0)),
        ],
        out_specs=pl.BlockSpec((1, Ho, WoC), lambda n: (n, 0, 0)),
        out_shape=jax.ShapeDtypeStruct((N, Ho, WoC), f32),
        compiler_params=cparams,
        cost_estimate=ce3,
    )(y2w, y3w, aff)

    # (N, Ho, Wo*Cout) -> NHWC -> NCHW (glue)
    return jnp.transpose(out.reshape(N, Ho, Wo, Cout), (0, 3, 1, 2))


# --------------------------------------------------------------------------- #
# pure-JAX reference (mirrors PyTorch ResBlock.forward in training mode)
# --------------------------------------------------------------------------- #
def resblock_reference(x_nchw, params, stride):
    x = jnp.transpose(x_nchw, (0, 2, 3, 1)).astype(jnp.float32)

    def bn(y, g, b):
        mu = jnp.mean(y, axis=(0, 1, 2), keepdims=True)
        var = jnp.mean((y - mu) ** 2, axis=(0, 1, 2), keepdims=True)
        return (y - mu) * jax.lax.rsqrt(var + EPS) * g.reshape(1, 1, 1, -1) \
            + b.reshape(1, 1, 1, -1)

    def conv(inp, w, s, pad):
        dn = jax.lax.conv_dimension_numbers(inp.shape, w.shape,
                                            ("NHWC", "HWIO", "NHWC"))
        return jax.lax.conv_general_dilated(inp, w, (s, s), pad,
                                            dimension_numbers=dn)

    y = conv(x, params["w1"], stride, ((1, 1), (1, 1))) + params["b1"]
    y = jnp.maximum(bn(y, params["g1"], params["be1"]), 0.0)
    y = conv(y, params["w2"], 1, ((1, 1), (1, 1))) + params["b2"]
    y = bn(y, params["g2"], params["be2"])
    Cin, Cout = params["w3"].shape
    sc = conv(x, params["w3"].reshape(1, 1, Cin, Cout), stride,
              ((0, 0), (0, 0))) + params["b3"]
    sc = bn(sc, params["g3"], params["be3"])
    return jnp.transpose(jnp.maximum(y + sc, 0.0), (0, 3, 1, 2))


if __name__ == "__main__":
    N, Cin, Cout, H, W, stride = 2, 4, 8, 16, 16, 2

    key = jax.random.PRNGKey(0)
    ks = jax.random.split(key, 13)
    nrm = lambda k, shp, sc=0.1: sc * jax.random.normal(k, shp, jnp.float32)

    params = {
        "w1": nrm(ks[0], (3, 3, Cin, Cout)),  "b1": nrm(ks[1], (Cout,)),
        "g1": 1.0 + nrm(ks[2], (Cout,)),      "be1": nrm(ks[3], (Cout,)),
        "w2": nrm(ks[4], (3, 3, Cout, Cout)), "b2": nrm(ks[5], (Cout,)),
        "g2": 1.0 + nrm(ks[6], (Cout,)),      "be2": nrm(ks[7], (Cout,)),
        "w3": nrm(ks[8], (Cin, Cout)),        "b3": nrm(ks[9], (Cout,)),
        "g3": 1.0 + nrm(ks[10], (Cout,)),     "be3": nrm(ks[11], (Cout,)),
    }
    x = jax.random.normal(ks[12], (N, Cin, H, W), jnp.float32)

    ref = jax.block_until_ready(resblock_reference(x, params, stride))

    # exact-math path (f32 operands / f32 intermediates): tight tolerance
    out_f32 = jax.block_until_ready(
        resblock_forward(x, params, stride, use_bf16=False))
    assert out_f32.shape == (N, Cout, H // stride, W // stride), out_f32.shape
    err_f32 = float(jnp.max(jnp.abs(out_f32 - ref)))
    assert err_f32 < 1e-4, f"f32 mismatch vs reference: {err_f32}"

    # fast path (bf16 MXU operands + bf16 HBM intermediates, f32 accumulation):
    # looser tolerance commensurate with bf16 rounding through two convs + BN.
    out_bf16 = jax.block_until_ready(
        resblock_forward(x, params, stride, use_bf16=True))
    assert out_bf16.shape == (N, Cout, H // stride, W // stride), out_bf16.shape
    err_bf16 = float(jnp.max(jnp.abs(out_bf16 - ref)))
    assert bool(jnp.all(jnp.isfinite(out_bf16))), "bf16 path produced non-finite"
    assert err_bf16 < 2.5e-1, f"bf16 mismatch vs reference: {err_bf16}"

    print("KERNEL_OK")
</pallas_src>

<mosaic_0001>
module attributes {stable_mosaic.version = 11 : i64} {
  func.func @kernel(%arg0: i32, %arg1: memref<1x4x88x4xf32, #tpu.memory_space<vmem>>, %arg2: memref<9x4x8xf32, #tpu.memory_space<vmem>>, %arg3: memref<4x8xf32, #tpu.memory_space<vmem>>, %arg4: memref<1x64x8xf32, #tpu.memory_space<vmem>>, %arg5: memref<1x64x8xf32, #tpu.memory_space<vmem>>, %arg6: memref<1x2x8xf32, #tpu.memory_space<vmem>>, %arg7: memref<1x2x8xf32, #tpu.memory_space<vmem>>) attributes {dimension_semantics = [#tpu.dimension_semantics<parallel>], iteration_bounds = array<i64: 2>, scalar_prefetch = 0 : i64, scratch_operands = 0 : i64, tpu.core_type = #tpu.core_type<tc>, window_params = [{transform_indices = @transform_0, window_bounds = array<i64: 1, 4, 88, 4>}, {pipeline_mode = #tpu.pipeline_mode<synchronous>, transform_indices = @transform_1, window_bounds = array<i64: 9, 4, 8>}, {pipeline_mode = #tpu.pipeline_mode<synchronous>, transform_indices = @transform_2, window_bounds = array<i64: 4, 8>}, {transform_indices = @transform_3, window_bounds = array<i64: 1, 64, 8>}, {transform_indices = @transform_4, window_bounds = array<i64: 1, 64, 8>}, {transform_indices = @transform_5, window_bounds = array<i64: 1, 2, 8>}, {transform_indices = @transform_6, window_bounds = array<i64: 1, 2, 8>}]} {
    %c0 = arith.constant 0 : index
    %c0_0 = arith.constant 0 : index
    %c0_1 = arith.constant 0 : index
    %c0_2 = arith.constant 0 : index
    %0 = vector.load %arg1[%c0, %c0_0, %c0_1, %c0_2] : memref<1x4x88x4xf32, #tpu.memory_space<vmem>>, vector<1x1x72x4xf32>
    %1 = vector.shape_cast %0 : vector<1x1x72x4xf32> to vector<72x4xf32>
    %c0_3 = arith.constant 0 : index
    %c0_4 = arith.constant 0 : index
    %c0_5 = arith.constant 0 : index
    %2 = vector.load %arg2[%c0_3, %c0_4, %c0_5] : memref<9x4x8xf32, #tpu.memory_space<vmem>>, vector<1x4x8xf32>
    %3 = vector.shape_cast %2 : vector<1x4x8xf32> to vector<4x8xf32>
    %cst = arith.constant dense<0.000000e+00> : vector<72x8xf32>
    %4 = tpu.matmul %1, %3, %cst {dimension_numbers = #tpu.dot_dimension_numbers<[1], [0], [0], [1], [0, 0, 1, 1], [], []>} : vector<72x4xf32>, vector<4x8xf32>, vector<72x8xf32> -> vector<72x8xf32>
    %c0_6 = arith.constant 0 : index
    %c1 = arith.constant 1 : index
    %c0_7 = arith.constant 0 : index
    %c0_8 = arith.constant 0 : index
    %5 = vector.load %arg1[%c0_6, %c1, %c0_7, %c0_8] : memref<1x4x88x4xf32, #tpu.memory_space<vmem>>, vector<1x1x72x4xf32>
    %6 = vector.shape_cast %5 : vector<1x1x72x4xf32> to vector<72x4xf32>
    %c1_9 = arith.constant 1 : index
    %c0_10 = arith.constant 0 : index
    %c0_11 = arith.constant 0 : index
    %7 = vector.load %arg2[%c1_9, %c0_10, %c0_11] : memref<9x4x8xf32, #tpu.memory_space<vmem>>, vector<1x4x8xf32>
    %8 = vector.shape_cast %7 : vector<1x4x8xf32> to vector<4x8xf32>
    %cst_12 = arith.constant dense<0.000000e+00> : vector<72x8xf32>
    %9 = tpu.matmul %6, %8, %cst_12 {dimension_numbers = #tpu.dot_dimension_numbers<[1], [0], [0], [1], [0, 0, 1, 1], [], []>} : vector<72x4xf32>, vector<4x8xf32>, vector<72x8xf32> -> vector<72x8xf32>
    %10 = arith.addf %4, %9 : vector<72x8xf32>
    %c0_13 = arith.constant 0 : index
    %c0_14 = arith.constant 0 : index
    %c1_15 = arith.constant 1 : index
    %c0_16 = arith.constant 0 : index
    %11 = vector.load %arg1[%c0_13, %c0_14, %c1_15, %c0_16] : memref<1x4x88x4xf32, #tpu.memory_space<vmem>>, vector<1x1x72x4xf32>
    %12 = vector.shape_cast %11 : vector<1x1x72x4xf32> to vector<72x4xf32>
    %c2 = arith.constant 2 : index
    %c0_17 = arith.constant 0 : index
    %c0_18 = arith.constant 0 : index
    %13 = vector.load %arg2[%c2, %c0_17, %c0_18] : memref<9x4x8xf32, #tpu.memory_space<vmem>>, vector<1x4x8xf32>
    %14 = vector.shape_cast %13 : vector<1x4x8xf32> to vector<4x8xf32>
    %cst_19 = arith.constant dense<0.000000e+00> : vector<72x8xf32>
    %15 = tpu.matmul %12, %14, %cst_19 {dimension_numbers = #tpu.dot_dimension_numbers<[1], [0], [0], [1], [0, 0, 1, 1], [], []>} : vector<72x4xf32>, vector<4x8xf32>, vector<72x8xf32> -> vector<72x8xf32>
    %16 = arith.addf %10, %15 : vector<72x8xf32>
    %c0_20 = arith.constant 0 : index
    %c2_21 = arith.constant 2 : index
    %c0_22 = arith.constant 0 : index
    %c0_23 = arith.constant 0 : index
    %17 = vector.load %arg1[%c0_20, %c2_21, %c0_22, %c0_23] : memref<1x4x88x4xf32, #tpu.memory_space<vmem>>, vector<1x1x72x4xf32>
    %18 = vector.shape_cast %17 : vector<1x1x72x4xf32> to vector<72x4xf32>
    %c3 = arith.constant 3 : index
    %c0_24 = arith.constant 0 : index
    %c0_25 = arith.constant 0 : index
    %19 = vector.load %arg2[%c3, %c0_24, %c0_25] : memref<9x4x8xf32, #tpu.memory_space<vmem>>, vector<1x4x8xf32>
    %20 = vector.shape_cast %19 : vector<1x4x8xf32> to vector<4x8xf32>
    %cst_26 = arith.constant dense<0.000000e+00> : vector<72x8xf32>
    %21 = tpu.matmul %18, %20, %cst_26 {dimension_numbers = #tpu.dot_dimension_numbers<[1], [0], [0], [1], [0, 0, 1, 1], [], []>} : vector<72x4xf32>, vector<4x8xf32>, vector<72x8xf32> -> vector<72x8xf32>
    %22 = arith.addf %16, %21 : vector<72x8xf32>
    %c0_27 = arith.constant 0 : index
    %c3_28 = arith.constant 3 : index
    %c0_29 = arith.constant 0 : index
    %c0_30 = arith.constant 0 : index
    %23 = vector.load %arg1[%c0_27, %c3_28, %c0_29, %c0_30] : memref<1x4x88x4xf32, #tpu.memory_space<vmem>>, vector<1x1x72x4xf32>
    %24 = vector.shape_cast %23 : vector<1x1x72x4xf32> to vector<72x4xf32>
    %c4 = arith.constant 4 : index
    %c0_31 = arith.constant 0 : index
    %c0_32 = arith.constant 0 : index
    %25 = vector.load %arg2[%c4, %c0_31, %c0_32] : memref<9x4x8xf32, #tpu.memory_space<vmem>>, vector<1x4x8xf32>
    %26 = vector.shape_cast %25 : vector<1x4x8xf32> to vector<4x8xf32>
    %cst_33 = arith.constant dense<0.000000e+00> : vector<72x8xf32>
    %27 = tpu.matmul %24, %26, %cst_33 {dimension_numbers = #tpu.dot_dimension_numbers<[1], [0], [0], [1], [0, 0, 1, 1], [], []>} : vector<72x4xf32>, vector<4x8xf32>, vector<72x8xf32> -> vector<72x8xf32>
    %28 = arith.addf %22, %27 : vector<72x8xf32>
    %c0_34 = arith.constant 0 : index
    %c2_35 = arith.constant 2 : index
    %c1_36 = arith.constant 1 : index
    %c0_37 = arith.constant 0 : index
    %29 = vector.load %arg1[%c0_34, %c2_35, %c1_36, %c0_37] : memref<1x4x88x4xf32, #tpu.memory_space<vmem>>, vector<1x1x72x4xf32>
    %30 = vector.shape_cast %29 : vector<1x1x72x4xf32> to vector<72x4xf32>
    %c5 = arith.constant 5 : index
    %c0_38 = arith.constant 0 : index
    %c0_39 = arith.constant 0 : index
    %31 = vector.load %arg2[%c5, %c0_38, %c0_39] : memref<9x4x8xf32, #tpu.memory_space<vmem>>, vector<1x4x8xf32>
    %32 = vector.shape_cast %31 : vector<1x4x8xf32> to vector<4x8xf32>
    %cst_40 = arith.constant dense<0.000000e+00> : vector<72x8xf32>
    %33 = tpu.matmul %30, %32, %cst_40 {dimension_numbers = #tpu.dot_dimension_numbers<[1], [0], [0], [1], [0, 0, 1, 1], [], []>} : vector<72x4xf32>, vector<4x8xf32>, vector<72x8xf32> -> vector<72x8xf32>
    %34 = arith.addf %28, %33 : vector<72x8xf32>
    %c0_41 = arith.constant 0 : index
    %c0_42 = arith.constant 0 : index
    %c9 = arith.constant 9 : index
    %c0_43 = arith.constant 0 : index
    %35 = vector.load %arg1[%c0_41, %c0_42, %c9, %c0_43] : memref<1x4x88x4xf32, #tpu.memory_space<vmem>>, vector<1x1x72x4xf32>
    %36 = vector.shape_cast %35 : vector<1x1x72x4xf32> to vector<72x4xf32>
    %c6 = arith.constant 6 : index
    %c0_44 = arith.constant 0 : index
    %c0_45 = arith.constant 0 : index
    %37 = vector.load %arg2[%c6, %c0_44, %c0_45] : memref<9x4x8xf32, #tpu.memory_space<vmem>>, vector<1x4x8xf32>
    %38 = vector.shape_cast %37 : vector<1x4x8xf32> to vector<4x8xf32>
    %cst_46 = arith.constant dense<0.000000e+00> : vector<72x8xf32>
    %39 = tpu.matmul %36, %38, %cst_46 {dimension_numbers = #tpu.dot_dimension_numbers<[1], [0], [0], [1], [0, 0, 1, 1], [], []>} : vector<72x4xf32>, vector<4x8xf32>, vector<72x8xf32> -> vector<72x8xf32>
    %40 = arith.addf %34, %39 : vector<72x8xf32>
    %c0_47 = arith.constant 0 : index
    %c1_48 = arith.constant 1 : index
    %c9_49 = arith.constant 9 : index
    %c0_50 = arith.constant 0 : index
    %41 = vector.load %arg1[%c0_47, %c1_48, %c9_49, %c0_50] : memref<1x4x88x4xf32, #tpu.memory_space<vmem>>, vector<1x1x72x4xf32>
    %42 = vector.shape_cast %41 : vector<1x1x72x4xf32> to vector<72x4xf32>
    %c7 = arith.constant 7 : index
    %c0_51 = arith.constant 0 : index
    %c0_52 = arith.constant 0 : index
    %43 = vector.load %arg2[%c7, %c0_51, %c0_52] : memref<9x4x8xf32, #tpu.memory_space<vmem>>, vector<1x4x8xf32>
    %44 = vector.shape_cast %43 : vector<1x4x8xf32> to vector<4x8xf32>
    %cst_53 = arith.constant dense<0.000000e+00> : vector<72x8xf32>
    %45 = tpu.matmul %42, %44, %cst_53 {dimension_numbers = #tpu.dot_dimension_numbers<[1], [0], [0], [1], [0, 0, 1, 1], [], []>} : vector<72x4xf32>, vector<4x8xf32>, vector<72x8xf32> -> vector<72x8xf32>
    %46 = arith.addf %40, %45 : vector<72x8xf32>
    %c0_54 = arith.constant 0 : index
    %c0_55 = arith.constant 0 : index
    %c10 = arith.constant 10 : index
    %c0_56 = arith.constant 0 : index
    %47 = vector.load %arg1[%c0_54, %c0_55, %c10, %c0_56] : memref<1x4x88x4xf32, #tpu.memory_space<vmem>>, vector<1x1x72x4xf32>
    %48 = vector.shape_cast %47 : vector<1x1x72x4xf32> to vector<72x4xf32>
    %c8 = arith.constant 8 : index
    %c0_57 = arith.constant 0 : index
    %c0_58 = arith.constant 0 : index
    %49 = vector.load %arg2[%c8, %c0_57, %c0_58] : memref<9x4x8xf32, #tpu.memory_space<vmem>>, vector<1x4x8xf32>
    %50 = vector.shape_cast %49 : vector<1x4x8xf32> to vector<4x8xf32>
    %cst_59 = arith.constant dense<0.000000e+00> : vector<72x8xf32>
    %51 = tpu.matmul %48, %50, %cst_59 {dimension_numbers = #tpu.dot_dimension_numbers<[1], [0], [0], [1], [0, 0, 1, 1], [], []>} : vector<72x4xf32>, vector<4x8xf32>, vector<72x8xf32> -> vector<72x8xf32>
    %52 = arith.addf %46, %51 : vector<72x8xf32>
    %c0_60 = arith.constant 0 : index
    %c3_61 = arith.constant 3 : index
    %c0_62 = arith.constant 0 : index
    %c0_63 = arith.constant 0 : index
    %53 = vector.load %arg1[%c0_60, %c3_61, %c0_62, %c0_63] : memref<1x4x88x4xf32, #tpu.memory_space<vmem>>, vector<1x1x72x4xf32>
    %54 = vector.shape_cast %53 : vector<1x1x72x4xf32> to vector<72x4xf32>
    %c0_64 = arith.constant 0 : index
    %c0_65 = arith.constant 0 : index
    %55 = vector.load %arg3[%c0_64, %c0_65] : memref<4x8xf32, #tpu.memory_space<vmem>>, vector<4x8xf32>
    %cst_66 = arith.constant dense<0.000000e+00> : vector<72x8xf32>
    %56 = tpu.matmul %54, %55, %cst_66 {dimension_numbers = #tpu.dot_dimension_numbers<[1], [0], [0], [1], [0, 0, 1, 1], [], []>} : vector<72x4xf32>, vector<4x8xf32>, vector<72x8xf32> -> vector<72x8xf32>
    %57 = vector.shape_cast %52 : vector<72x8xf32> to vector<8x9x8xf32>
    %58 = vector.extract_strided_slice %57 {offsets = [0, 0, 0], sizes = [8, 8, 8], strides = [1, 1, 1]} : vector<8x9x8xf32> to vector<8x8x8xf32>
    %59 = vector.shape_cast %58 : vector<8x8x8xf32> to vector<64x8xf32>
    %60 = vector.shape_cast %56 : vector<72x8xf32> to vector<8x9x8xf32>
    %61 = vector.extract_strided_slice %60 {offsets = [0, 0, 0], sizes = [8, 8, 8], strides = [1, 1, 1]} : vector<8x9x8xf32> to vector<8x8x8xf32>
    %62 = vector.shape_cast %61 : vector<8x8x8xf32> to vector<64x8xf32>
    %c0_67 = arith.constant 0 : index
    %c0_68 = arith.constant 0 : index
    %c0_69 = arith.constant 0 : index
    %63 = vector.load %arg4[%c0_67, %c0_68, %c0_69] : memref<1x64x8xf32, #tpu.memory_space<vmem>>, vector<1x64x8xf32>
    %64 = vector.shape_cast %63 : vector<1x64x8xf32> to vector<64x8xf32>
    %65 = vector.shape_cast %59 : vector<64x8xf32> to vector<1x64x8xf32>
    tpu.vector_store %arg4[%c0_67, %c0_68, %c0_69], %65 {strides = array<i32>} : memref<1x64x8xf32, #tpu.memory_space<vmem>>, vector<1x64x8xf32>,
    %c0_70 = arith.constant 0 : index
    %c0_71 = arith.constant 0 : index
    %c0_72 = arith.constant 0 : index
    %66 = vector.load %arg5[%c0_70, %c0_71, %c0_72] : memref<1x64x8xf32, #tpu.memory_space<vmem>>, vector<1x64x8xf32>
    %67 = vector.shape_cast %66 : vector<1x64x8xf32> to vector<64x8xf32>
    %68 = vector.shape_cast %62 : vector<64x8xf32> to vector<1x64x8xf32>
    tpu.vector_store %arg5[%c0_70, %c0_71, %c0_72], %68 {strides = array<i32>} : memref<1x64x8xf32, #tpu.memory_space<vmem>>, vector<1x64x8xf32>,
    %cst_73 = arith.constant dense<0.000000e+00> : vector<8xf32>
    %69 = vector.multi_reduction <add>, %59, %cst_73 [0] : vector<64x8xf32> to vector<8xf32>
    %70 = vector.shape_cast %69 : vector<8xf32> to vector<1x8xf32>
    %c0_74 = arith.constant 0 : index
    %c0_75 = arith.constant 0 : index
    %c0_76 = arith.constant 0 : index
    %71 = vector.load %arg6[%c0_74, %c0_75, %c0_76] : memref<1x2x8xf32, #tpu.memory_space<vmem>>, vector<1x1x8xf32>
    %72 = vector.shape_cast %71 : vector<1x1x8xf32> to vector<1x8xf32>
    %73 = vector.shape_cast %70 : vector<1x8xf32> to vector<1x1x8xf32>
    tpu.vector_store %arg6[%c0_74, %c0_75, %c0_76], %73 {strides = array<i32>} : memref<1x2x8xf32, #tpu.memory_space<vmem>>, vector<1x1x8xf32>,
    %74 = arith.mulf %59, %59 : vector<64x8xf32>
    %cst_77 = arith.constant dense<0.000000e+00> : vector<8xf32>
    %75 = vector.multi_reduction <add>, %74, %cst_77 [0] : vector<64x8xf32> to vector<8xf32>
    %76 = vector.shape_cast %75 : vector<8xf32> to vector<1x8xf32>
    %c0_78 = arith.constant 0 : index
    %c1_79 = arith.constant 1 : index
    %c0_80 = arith.constant 0 : index
    %77 = vector.load %arg6[%c0_78, %c1_79, %c0_80] : memref<1x2x8xf32, #tpu.memory_space<vmem>>, vector<1x1x8xf32>
    %78 = vector.shape_cast %77 : vector<1x1x8xf32> to vector<1x8xf32>
    %79 = vector.shape_cast %76 : vector<1x8xf32> to vector<1x1x8xf32>
    tpu.vector_store %arg6[%c0_78, %c1_79, %c0_80], %79 {strides = array<i32>} : memref<1x2x8xf32, #tpu.memory_space<vmem>>, vector<1x1x8xf32>,
    %cst_81 = arith.constant dense<0.000000e+00> : vector<8xf32>
    %80 = vector.multi_reduction <add>, %62, %cst_81 [0] : vector<64x8xf32> to vector<8xf32>
    %81 = vector.shape_cast %80 : vector<8xf32> to vector<1x8xf32>
    %c0_82 = arith.constant 0 : index
    %c0_83 = arith.constant 0 : index
    %c0_84 = arith.constant 0 : index
    %82 = vector.load %arg7[%c0_82, %c0_83, %c0_84] : memref<1x2x8xf32, #tpu.memory_space<vmem>>, vector<1x1x8xf32>
    %83 = vector.shape_cast %82 : vector<1x1x8xf32> to vector<1x8xf32>
    %84 = vector.shape_cast %81 : vector<1x8xf32> to vector<1x1x8xf32>
    tpu.vector_store %arg7[%c0_82, %c0_83, %c0_84], %84 {strides = array<i32>} : memref<1x2x8xf32, #tpu.memory_space<vmem>>, vector<1x1x8xf32>,
    %85 = arith.mulf %62, %62 : vector<64x8xf32>
    %cst_85 = arith.constant dense<0.000000e+00> : vector<8xf32>
    %86 = vector.multi_reduction <add>, %85, %cst_85 [0] : vector<64x8xf32> to vector<8xf32>
    %87 = vector.shape_cast %86 : vector<8xf32> to vector<1x8xf32>
    %c0_86 = arith.constant 0 : index
    %c1_87 = arith.constant 1 : index
    %c0_88 = arith.constant 0 : index
    %88 = vector.load %arg7[%c0_86, %c1_87, %c0_88] : memref<1x2x8xf32, #tpu.memory_space<vmem>>, vector<1x1x8xf32>
    %89 = vector.shape_cast %88 : vector<1x1x8xf32> to vector<1x8xf32>
    %90 = vector.shape_cast %87 : vector<1x8xf32> to vector<1x1x8xf32>
    tpu.vector_store %arg7[%c0_86, %c1_87, %c0_88], %90 {strides = array<i32>} : memref<1x2x8xf32, #tpu.memory_space<vmem>>, vector<1x1x8xf32>,
    return
  }
  func.func @transform_0(%arg0: i32) -> (i32, i32, i32, i32) {
    %c0_i32 = arith.constant 0 : i32
    %c0_i32_0 = arith.constant 0 : i32
    %c0_i32_1 = arith.constant 0 : i32
    %c0_i32_2 = arith.constant 0 : i32
    return %arg0, %c0_i32, %c0_i32_0, %c0_i32_1 : i32, i32, i32, i32
  }
  func.func @transform_1(%arg0: i32) -> (i32, i32, i32) {
    %c0_i32 = arith.constant 0 : i32
    %c0_i32_0 = arith.constant 0 : i32
    %c0_i32_1 = arith.constant 0 : i32
    %c0_i32_2 = arith.constant 0 : i32
    return %c0_i32, %c0_i32_0, %c0_i32_1 : i32, i32, i32
  }
  func.func @transform_2(%arg0: i32) -> (i32, i32) {
    %c0_i32 = arith.constant 0 : i32
    %c0_i32_0 = arith.constant 0 : i32
    %c0_i32_1 = arith.constant 0 : i32
    return %c0_i32, %c0_i32_0 : i32, i32
  }
  func.func @transform_3(%arg0: i32) -> (i32, i32, i32) {
    %c0_i32 = arith.constant 0 : i32
    %c0_i32_0 = arith.constant 0 : i32
    %c0_i32_1 = arith.constant 0 : i32
    return %arg0, %c0_i32, %c0_i32_0 : i32, i32, i32
  }
  func.func @transform_4(%arg0: i32) -> (i32, i32, i32) {
    %c0_i32 = arith.constant 0 : i32
    %c0_i32_0 = arith.constant 0 : i32
    %c0_i32_1 = arith.constant 0 : i32
    return %arg0, %c0_i32, %c0_i32_0 : i32, i32, i32
  }
  func.func @transform_5(%arg0: i32) -> (i32, i32, i32) {
    %c0_i32 = arith.constant 0 : i32
    %c0_i32_0 = arith.constant 0 : i32
    %c0_i32_1 = arith.constant 0 : i32
    return %arg0, %c0_i32, %c0_i32_0 : i32, i32, i32
  }
  func.func @transform_6(%arg0: i32) -> (i32, i32, i32) {
    %c0_i32 = arith.constant 0 : i32
    %c0_i32_0 = arith.constant 0 : i32
    %c0_i32_1 = arith.constant 0 : i32
    return %arg0, %c0_i32, %c0_i32_0 : i32, i32, i32
  }
}

</mosaic_0001>

<bundles_post_ra>
// kernel: tpu_custom_call.1
= control target key start
LH: loop header
LB: loop body
LE: loop exit
PB: predicated region body
PF: predicated region fallthrough
CT: control target
= control target key end

     0   :  { %12 = vsyncpa [#allocation3], 0  ;;  %s7285_s0 = inlined_call_operand.vmem [shape: f32[2,4,88,4], index: 0, kind: input, shape index: {}]   ;;  %s7286_s1 = inlined_call_operand.vmem [shape: f32[9,4,8], index: 1, kind: input, shape index: {}]   ;;  %s7287_s2 = inlined_call_operand.vmem [shape: f32[4,8], index: 2, kind: input, shape index: {}]   ;;  %s7288_s3 = inlined_call_operand.vmem [shape: f32[2,64,8], index: 3, kind: output, shape index: {0}]   ;;  %s7289_s4 = inlined_call_operand.vmem [shape: f32[2,64,8], index: 4, kind: output, shape index: {1}]   ;;  %s7290_s5 = inlined_call_operand.hbm [shape: f32[2,2,8], index: 5, kind: output, shape index: {2}]   ;;  %s7291_s6 = inlined_call_operand.hbm [shape: f32[2,2,8], index: 6, kind: output, shape index: {3}]  }
   0x1   :  { %14 = vsyncpa [#allocation3 + $0x1], 0 }
   0x2   :  { %15 = vsyncpa [#allocation5], 0 }
   0x3   :  { %17 = vsyncpa [#allocation5 + $0x1], 0  ;;  %s5893_s21 = smov 0   ;;  %s5895_s22 = smov 0  }
   0x4   :  { %s5897_s23 = smov 0   ;;  %s5899_s24 = smov 0  }
   0x5 LB: > { %s5914_s25 = sadd.s32 4294967295, %s5851_s24   ;;  %s4996_s26 = sadd.s32 4294967294, %s5851_s24   ;;  %s5851_s24 = sphi %s5899_s24, %s7297_s24   ;;  %s5847_s23 = sphi %s5897_s23, %s7296_s23   ;;  %s5843_s22 = sphi %s5895_s22, %s7295_s22   ;;  %s5839_s21 = sphi %s5893_s21, %s7294_s21  }
   0x6   : > { %s5918_s27 = sadd.s32 1, %s5851_s24   ;;  %s150_s28 = sadd.s32 1, %s5847_s23 }
   0x7   : > { %s147_s29 = ssub.s32 %s5851_s24, %s5918_s27  ;;  %p160_p0 = scmp.ne.s32.totalorder %s5847_s23, %s5843_s22 }
   0x8   : > { %p148_p1 = scmp.eq.s32.totalorder %s147_s29, 0  ;;  %p161_p2 = scmp.eq.s32.totalorder %s5914_s25, 1 }
   0x9   : > { %p166_p3 = scmp.ne.s32.totalorder %s5843_s22, %s5839_s21  ;;  %p167_p4 = scmp.eq.s32.totalorder %s4996_s26, 1 }
   0xa   : > { %s5929_s30 = scalar_select %p148_p1, %s5847_s23, %s150_s28  }
   0xb   : > { %p5931_p5 = por %p161_p2, %p160_p0  ;;  %p5935_p6 = por %p167_p4, %p166_p3 }
   0xc   : > { %p4999_p7 = scmp.ge.s32.totalorder %s5851_s24, 1  ;;  %p225_p8 = scmp.lt.s32.totalorder %s5851_s24, 3 }
   0xe   : > { %p226_p9 = pnand %p4999_p7, %p225_p8 }
   0xf   : > { %vm335_vm0 = vcmask (!%p226_p9), 1043456   ;;  %v5077_v0 = vld [vmem:[%s7286_s1 + $0x10] sm:$0xf] (!%p226_p9)  ;;  %v5016_v1 = vld [vmem:[%s7286_s1 + $0x4] sm:$0xf] (!%p226_p9)  ;;  %v5853_v2 = vmov (!%p226_p9), 0.0  }
  0x10   : > { %229 = sbr.rel (%p226_p9) target bundleno = 649 (0x289), region = 32  ;;  %5400 = vmatprep.subr.mxu0 (!%p226_p9), %v5853_v2  ;;  %5284 = vmatprep.subr.mxu1 (!%p226_p9), %v5853_v2  ;;  %p270_p10 = scmp.lt.s32.totalorder (!%p226_p9), %s5914_s25, 1  ;;  %vm5854_vm1 = vmmov (!%p226_p9), 0   ;;  %vm307_vm2 = vcmask (!%p226_p9), 31744   ;;  %v5097_v3 = vld [vmem:[%s7286_s1 + $0x14] sm:$0xf] (!%p226_p9) }
  0x11   : > { %5401 = vmatpush3.msk.msra.mxu0 (!%p226_p9), %vm335_vm0, %v5077_v0  ;;  %5285 = vmatpush3.msk.msra.mxu1 (!%p226_p9), %vm335_vm0, %v5016_v1  ;;  %v294_v4 = vld [vmem:[%s7286_s1] sm:$0xf] (!%p226_p9)  ;;  %v5108_v25 = vld [vmem:[%s7286_s1 + $0x18] sm:$0xf] (!%p226_p9)  ;;  %v5037_v26 = vld [vmem:[%s7286_s1 + $0x8] sm:$0xf] (!%p226_p9) }
  0x12   : > { %5286 = vmatprep.mubr.msk.f32.mxu1 (!%p226_p9), %vm5854_vm1, %v5853_v2  ;;  %5402 = vmatprep.mubr.msk.f32.mxu0 (!%p226_p9), %vm5854_vm1, %v5853_v2  ;;  %v5128_v45 = vld [vmem:[%s7286_s1 + $0x1c] sm:$0xf] (!%p226_p9)  ;;  %v5057_v46 = vld [vmem:[%s7286_s1 + $0xc] sm:$0xf] (!%p226_p9)  ;;  %v5139_v57 = vld [vmem:[%s7286_s1 + $0x20] sm:$0xf] (!%p226_p9) }
  0x13   : > { %5429 = vmatprep.subr.mxu0 (!%p226_p9), %v5853_v2  ;;  %5313 = vmatprep.subr.mxu1 (!%p226_p9), %v5853_v2  ;;  %v1711_v58 = vld [vmem:[%s7287_s2] sm:$0xf] (!%p226_p9)  ;;  %vm3245_vm3 = vcmask (!%p226_p9), 64512   ;;  %vm3683_vm4 = vcmask (!%p226_p9), 57344   ;;  %s5178_s15 = sshll.u32 (!%p226_p9), %s5914_s25, 5 }
  0x14   : > { %s7210_s26 = scalar_lea.hbm (!%p226_p9), %s7290_s5, %s5178_s15 }
  0x17   : > { %s5957_s13 = scalar_select %p270_p10, %s5914_s25, 1 }
  0x19   : > { %s5709_s14 = smul.u32 352, %s5957_s13 }
  0x1b   : > { %s5965_s17 = scalar_lea.vmem %s7285_s0, %s5709_s14 }
  0x1c   : > { %v5007_v5 = vld [vmem:[%s5965_s17 + $0x58] sm:$0xff]  ;;  %v5975_v6 = vld [vmem:[%s5965_s17 + $0x108] sm:$0xff]  ;;  %v5008_v7 = vld [vmem:[%s5965_s17 + $0x60] sm:$0xff] }
  0x1d   : > { %5287 = vmatmul.mubr.msk.f32.vlgmr.msra.gmra.mrb[0].mxu1 %vm307_vm2, %v5007_v5  ;;  %5403 = vmatmul.mubr.msk.f32.vlgmr.msra.gmra.mrb[0].mxu0 %vm307_vm2, %v5975_v6  ;;  %v5984_v8 = vld [vmem:[%s5965_s17 + $0x110] sm:$0xff]  ;;  %v5009_v9 = vld [vmem:[%s5965_s17 + $0x68] sm:$0xff]  ;;  %v6001_v10 = vld [vmem:[%s5965_s17 + $0x118] sm:$0xff] }
  0x1e   : > { %5430 = vmatpush3.msk.msra.mxu0 %vm335_vm0, %v5097_v3  ;;  %5314 = vmatpush3.msk.msra.mxu1 %vm335_vm0, %v294_v4  ;;  %v5010_v11 = vld [vmem:[%s5965_s17 + $0x70] sm:$0xff]  ;;  %v6012_v12 = vld [vmem:[%s5965_s17 + $0x120] sm:$0xff]  ;;  %v5011_v13 = vld [vmem:[%s5965_s17 + $0x78] sm:$0xff] }
  0x1f   : > { %5289 = vmatprep.mubr.msk.f32.mxu1 %vm5854_vm1, %v5853_v2  ;;  %5405 = vmatprep.mubr.msk.f32.mxu0 %vm5854_vm1, %v5853_v2  ;;  %v6023_v14 = vld [vmem:[%s5965_s17 + $0x128] sm:$0xff]  ;;  %v5012_v15 = vld [vmem:[%s5965_s17 + $0x80] sm:$0xff]  ;;  %v6034_v16 = vld [vmem:[%s5965_s17 + $0x130] sm:$0xff] }
  0x20   : > { %5458 = vmatprep.subr.mxu0 %v5853_v2  ;;  %5342 = vmatprep.subr.mxu1 %v5853_v2  ;;  %v5013_v17 = vld [vmem:[%s5965_s17 + $0x88] sm:$0xff]  ;;  %v6045_v18 = vld [vmem:[%s5965_s17 + $0x138] sm:$0xff]  ;;  %v5014_v19 = vld [vmem:[%s5965_s17 + $0x90] sm:$0xff] }
  0x21   : > { %5290 = vmatmul.mubr.msk.f32.gmra.mrb[2].mxu1 %vm307_vm2, %v5008_v7  ;;  %5406 = vmatmul.mubr.msk.f32.gmra.mrb[2].mxu0 %vm307_vm2, %v5984_v8  ;;  %v6056_v20 = vld [vmem:[%s5965_s17 + $0x140] sm:$0xff]  ;;  %v5015_v21 = vld [vmem:[%s5965_s17 + $0x98] sm:$0xff]  ;;  %v6067_v22 = vld [vmem:[%s5965_s17 + $0x148] sm:$0xff] }
  0x22   : > { %5292 = vmatprep.mubr.msk.f32.mxu1 %vm5854_vm1, %v5853_v2  ;;  %5408 = vmatprep.mubr.msk.f32.mxu0 %vm5854_vm1, %v5853_v2  ;;  %v285_v23 = vld [vmem:[%s5965_s17] sm:$0xff]  ;;  %v5088_v24 = vld [vmem:[%s5965_s17 + $0xb1] sm:$0xff]  ;;  %v286_v27 = vld [vmem:[%s5965_s17 + $0x8] sm:$0xff] }
  0x23   : > { %v5089_v28 = vld [vmem:[%s5965_s17 + $0xb9] sm:$0xff]  ;;  %v287_v29 = vld [vmem:[%s5965_s17 + $0x10] sm:$0xff]  ;;  %v5090_v30 = vld [vmem:[%s5965_s17 + $0xc1] sm:$0xff] }
  0x24   : > { %v288_v31 = vld [vmem:[%s5965_s17 + $0x18] sm:$0xff]  ;;  %v5091_v32 = vld [vmem:[%s5965_s17 + $0xc9] sm:$0xff]  ;;  %v289_v33 = vld [vmem:[%s5965_s17 + $0x20] sm:$0xff] }
  0x25   : > { %5293 = vmatmul.mubr.msk.f32.gmra.mrb[4].mxu1 %vm307_vm2, %v5009_v9  ;;  %5409 = vmatmul.mubr.msk.f32.gmra.mrb[4].mxu0 %vm307_vm2, %v6001_v10  ;;  %v5092_v34 = vld [vmem:[%s5965_s17 + $0xd1] sm:$0xff]  ;;  %v290_v35 = vld [vmem:[%s5965_s17 + $0x28] sm:$0xff]  ;;  %v5093_v36 = vld [vmem:[%s5965_s17 + $0xd9] sm:$0xff] }
  0x26   : > { %5295 = vmatprep.mubr.msk.f32.mxu1 %vm5854_vm1, %v5853_v2  ;;  %5411 = vmatprep.mubr.msk.f32.mxu0 %vm5854_vm1, %v5853_v2  ;;  %v291_v37 = vld [vmem:[%s5965_s17 + $0x30] sm:$0xff]  ;;  %v5094_v38 = vld [vmem:[%s5965_s17 + $0xe1] sm:$0xff]  ;;  %v292_v39 = vld [vmem:[%s5965_s17 + $0x38] sm:$0xff] }
  0x27   : > { %v5095_v40 = vld [vmem:[%s5965_s17 + $0xe9] sm:$0xff]  ;;  %v293_v41 = vld [vmem:[%s5965_s17 + $0x40] sm:$0xff]  ;;  %v5096_v42 = vld [vmem:[%s5965_s17 + $0xf1] sm:$0xff] }
  0x28   : > { %v589_v43 = vld [vmem:[%s5965_s17 + $0x1] sm:$0xff]  ;;  %v1231_v44 = vld [vmem:[%s5965_s17 + $0x9] sm:$0xff]  ;;  %v1232_v47 = vld [vmem:[%s5965_s17 + $0x11] sm:$0xff] }
  0x29   : > { %5296 = vmatmul.mubr.msk.f32.gmra.mrb[6].mxu1 %vm307_vm2, %v5010_v11  ;;  %5412 = vmatmul.mubr.msk.f32.gmra.mrb[6].mxu0 %vm307_vm2, %v6012_v12  ;;  %v1233_v48 = vld [vmem:[%s5965_s17 + $0x19] sm:$0xff]  ;;  %v1234_v49 = vld [vmem:[%s5965_s17 + $0x21] sm:$0xff]  ;;  %v1235_v50 = vld [vmem:[%s5965_s17 + $0x29] sm:$0xff] }
  0x2a   : > { %5298 = vmatprep.mubr.msk.f32.mxu1 %vm5854_vm1, %v5853_v2  ;;  %5414 = vmatprep.mubr.msk.f32.mxu0 %vm5854_vm1, %v5853_v2  ;;  %v1236_v51 = vld [vmem:[%s5965_s17 + $0x31] sm:$0xff]  ;;  %v1237_v52 = vld [vmem:[%s5965_s17 + $0x39] sm:$0xff]  ;;  %v1238_v53 = vld [vmem:[%s5965_s17 + $0x41] sm:$0xff] }
  0x2b   : > { %v1239_v54 = vld [vmem:[%s5965_s17 + $0x49] sm:$0xff]  ;;  %v5119_v56 = vld [vmem:[%s5965_s17 + $0x61] sm:$0xff]  ;;  %v5049_v59 = vld [vmem:[%s5965_s17 + $0xb8] sm:$0xff] }
  0x2c   : > { %v5048_v55 = vld [vmem:[%s5965_s17 + $0xb0] sm:$0xff]  ;;  %v5050_v61 = vld [vmem:[%s5965_s17 + $0xc0] sm:$0xff]  ;;  %v5051_v63 = vld [vmem:[%s5965_s17 + $0xc8] sm:$0xff] }
  0x2d   : > { %5299 = vmatmul.mubr.msk.f32.gmra.mrb[8].mxu1 %vm307_vm2, %v5011_v13  ;;  %5415 = vmatmul.mubr.msk.f32.gmra.mrb[8].mxu0 %vm307_vm2, %v6023_v14  ;;  %v5120_v60 = vld [vmem:[%s5965_s17 + $0x69] sm:$0xff]  ;;  %v5121_v62 = vld [vmem:[%s5965_s17 + $0x71] sm:$0xff]  ;;  %v5122_v0 = vld [vmem:[%s5965_s17 + $0x79] sm:$0xff] }
  0x2e   : > { %5301 = vmatprep.mubr.msk.f32.mxu1 %vm5854_vm1, %v5853_v2  ;;  %5417 = vmatprep.mubr.msk.f32.mxu0 %vm5854_vm1, %v5853_v2  ;;  %v5052_v1 = vld [vmem:[%s5965_s17 + $0xd0] sm:$0xff]  ;;  %v5123_v3 = vld [vmem:[%s5965_s17 + $0x81] sm:$0xff]  ;;  %v5053_v4 = vld [vmem:[%s5965_s17 + $0xd8] sm:$0xff] }
  0x2f   : > { %v5124_v5 = vld [vmem:[%s5965_s17 + $0x89] sm:$0xff]  ;;  %v5054_v7 = vld [vmem:[%s5965_s17 + $0xe0] sm:$0xff]  ;;  %v5125_v9 = vld [vmem:[%s5965_s17 + $0x91] sm:$0xff] }
  0x30   : > { %v5055_v11 = vld [vmem:[%s5965_s17 + $0xe8] sm:$0xff]  ;;  %v5126_v13 = vld [vmem:[%s5965_s17 + $0x99] sm:$0xff] }
  0x31   : > { %5302 = vmatmul.mubr.msk.f32.gmra.mrb[10].mxu1 %vm307_vm2, %v5012_v15  ;;  %5418 = vmatmul.mubr.msk.f32.gmra.mrb[10].mxu0 %vm307_vm2, %v6034_v16  ;;  %v5056_v15 = vld [vmem:[%s5965_s17 + $0xf0] sm:$0xff] }
  0x32   : > { %5304 = vmatprep.mubr.msk.f32.mxu1 %vm5854_vm1, %v5853_v2  ;;  %5420 = vmatprep.mubr.msk.f32.mxu0 %vm5854_vm1, %v5853_v2 }
  0x35   : > { %5305 = vmatmul.mubr.msk.f32.gmra.mrb[12].mxu1 %vm307_vm2, %v5013_v17  ;;  %5421 = vmatmul.mubr.msk.f32.gmra.mrb[12].mxu0 %vm307_vm2, %v6045_v18  ;;  %v5127_v17 = vld [vmem:[%s5965_s17 + $0xa1] sm:$0xff] }
  0x36   : > { %5307 = vmatprep.mubr.msk.f32.mxu1 %vm5854_vm1, %v5853_v2  ;;  %5423 = vmatprep.mubr.msk.f32.mxu0 %vm5854_vm1, %v5853_v2 }
  0x39   : > { %5308 = vmatmul.mubr.msk.f32.gmra.mrb[14].mxu1 %vm307_vm2, %v5014_v19  ;;  %5424 = vmatmul.mubr.msk.f32.gmra.mrb[14].mxu0 %vm307_vm2, %v6056_v20  ;;  %v1551_v19 = vld [vmem:[%s5965_s17 + $0xa] sm:$0xff] }
  0x3a   : > { %5310 = vmatprep.mubr.msk.f32.mxu1 %vm5854_vm1, %v5853_v2  ;;  %5426 = vmatprep.mubr.msk.f32.mxu0 %vm5854_vm1, %v5853_v2 }
  0x3d   : > { %5311 = vmatmul.mubr.msk.f32.gmra.mrb[16].mxu1 %vm307_vm2, %v5015_v21  ;;  %5427 = vmatmul.mubr.msk.f32.gmra.mrb[16].mxu0 %vm307_vm2, %v6067_v22  ;;  %v1552_v21 = vld [vmem:[%s5965_s17 + $0x12] sm:$0xff] }
  0x3e   : > { %5315 = vmatprep.mubr.msk.f32.mxu1 %vm5854_vm1, %v5853_v2  ;;  %5431 = vmatprep.mubr.msk.f32.mxu0 %vm5854_vm1, %v5853_v2 }
  0x41   : > { %5316 = vmatmul.mubr.msk.f32.vlgmr.msra.gmra.mrb[0].mxu1 %vm307_vm2, %v285_v23  ;;  %5432 = vmatmul.mubr.msk.f32.vlgmr.msra.gmra.mrb[0].mxu0 %vm307_vm2, %v5088_v24  ;;  %v1558_v23 = vld [vmem:[%s5965_s17 + $0x42] sm:$0xff] }
  0x42   : > { %5459 = vmatpush3.msk.msra.mxu0 %vm335_vm0, %v5108_v25  ;;  %5343 = vmatpush3.msk.msra.mxu1 %vm335_vm0, %v5037_v26 }
  0x43   : > { %5318 = vmatprep.mubr.msk.f32.mxu1 %vm5854_vm1, %v5853_v2  ;;  %5434 = vmatprep.mubr.msk.f32.mxu0 %vm5854_vm1, %v5853_v2 }
  0x44   : > { %5487 = vmatprep.subr.mxu0 %v5853_v2  ;;  %5371 = vmatprep.subr.mxu1 %v5853_v2 }
  0x45   : > { %5319 = vmatmul.mubr.msk.f32.gmra.mrb[2].mxu1 %vm307_vm2, %v286_v27  ;;  %5435 = vmatmul.mubr.msk.f32.gmra.mrb[2].mxu0 %vm307_vm2, %v5089_v28 }
  0x46   : > { %5321 = vmatprep.mubr.msk.f32.mxu1 %vm5854_vm1, %v5853_v2  ;;  %5437 = vmatprep.mubr.msk.f32.mxu0 %vm5854_vm1, %v5853_v2 }
  0x49   : > { %5322 = vmatmul.mubr.msk.f32.gmra.mrb[4].mxu1 %vm307_vm2, %v287_v29  ;;  %5438 = vmatmul.mubr.msk.f32.gmra.mrb[4].mxu0 %vm307_vm2, %v5090_v30 }
  0x4a   : > { %5324 = vmatprep.mubr.msk.f32.mxu1 %vm5854_vm1, %v5853_v2  ;;  %5440 = vmatprep.mubr.msk.f32.mxu0 %vm5854_vm1, %v5853_v2 }
  0x4d   : > { %5325 = vmatmul.mubr.msk.f32.gmra.mrb[6].mxu1 %vm307_vm2, %v288_v31  ;;  %5441 = vmatmul.mubr.msk.f32.gmra.mrb[6].mxu0 %vm307_vm2, %v5091_v32 }
  0x4e   : > { %5327 = vmatprep.mubr.msk.f32.mxu1 %vm5854_vm1, %v5853_v2  ;;  %5443 = vmatprep.mubr.msk.f32.mxu0 %vm5854_vm1, %v5853_v2 }
  0x51   : > { %5328 = vmatmul.mubr.msk.f32.gmra.mrb[8].mxu1 %vm307_vm2, %v289_v33  ;;  %5444 = vmatmul.mubr.msk.f32.gmra.mrb[8].mxu0 %vm307_vm2, %v5092_v34  ;;  %v5855_v34 = vmov 1966171168  }
  0x52   : > { %5330 = vmatprep.mubr.msk.f32.mxu1 %vm5854_vm1, %v5853_v2  ;;  %5446 = vmatprep.mubr.msk.f32.mxu0 %vm5854_vm1, %v5853_v2 }
  0x55   : > { %5331 = vmatmul.mubr.msk.f32.gmra.mrb[10].mxu1 %vm307_vm2, %v290_v35  ;;  %5447 = vmatmul.mubr.msk.f32.gmra.mrb[10].mxu0 %vm307_vm2, %v5093_v36  ;;  %v1836_v35 = vunpack.c.l.s4 %v5855_v34  ;;  %v1838_v36 = vlaneseq }
  0x56   : > { %5333 = vmatprep.mubr.msk.f32.mxu1 %vm5854_vm1, %v5853_v2  ;;  %5449 = vmatprep.mubr.msk.f32.mxu0 %vm5854_vm1, %v5853_v2 }
  0x59   : > { %5334 = vmatmul.mubr.msk.f32.gmra.mrb[12].mxu1 %vm307_vm2, %v291_v37  ;;  %5450 = vmatmul.mubr.msk.f32.gmra.mrb[12].mxu0 %vm307_vm2, %v5094_v38 }
  0x5a   : > { %5336 = vmatprep.mubr.msk.f32.mxu1 %vm5854_vm1, %v5853_v2  ;;  %5452 = vmatprep.mubr.msk.f32.mxu0 %vm5854_vm1, %v5853_v2 }
  0x5d   : > { %5337 = vmatmul.mubr.msk.f32.gmra.mrb[14].mxu1 %vm307_vm2, %v292_v39  ;;  %5453 = vmatmul.mubr.msk.f32.gmra.mrb[14].mxu0 %vm307_vm2, %v5095_v40  ;;  %v1837_v39 = vunpack.c.0.s8 %v1836_v35  ;;  %v1839_v40 = vshrl.u32 %v1838_v36, 7 }
  0x5e   : > { %5339 = vmatprep.mubr.msk.f32.mxu1 %vm5854_vm1, %v5853_v2  ;;  %5455 = vmatprep.mubr.msk.f32.mxu0 %vm5854_vm1, %v5853_v2 }
  0x61   : > { %5340 = vmatmul.mubr.msk.f32.gmra.mrb[16].mxu1 %vm307_vm2, %v293_v41  ;;  %5456 = vmatmul.mubr.msk.f32.gmra.mrb[16].mxu0 %vm307_vm2, %v5096_v42 }
  0x62   : > { %5344 = vmatprep.mubr.msk.f32.mxu1 %vm5854_vm1, %v5853_v2  ;;  %5460 = vmatprep.mubr.msk.f32.mxu0 %vm5854_vm1, %v5853_v2 }
  0x65   : > { %5345 = vmatmul.mubr.msk.f32.vlgmr.msra.gmra.mrb[0].mxu1 %vm307_vm2, %v589_v43  ;;  %5461 = vmatmul.mubr.msk.f32.vlgmr.msra.gmra.mrb[0].mxu0 %vm307_vm2, %v1231_v44  ;;  %v6396_v43 = vsub.s32 %v1837_v39, %v1839_v40 }
  0x66   : > { %5488 = vmatpush3.msk.msra.mxu0 %vm335_vm0, %v5128_v45  ;;  %5372 = vmatpush3.msk.msra.mxu1 %vm335_vm0, %v5057_v46 }
  0x67   : > { %5347 = vmatprep.mubr.msk.f32.mxu1 %vm5854_vm1, %v5853_v2  ;;  %5463 = vmatprep.mubr.msk.f32.mxu0 %vm5854_vm1, %v5853_v2 }
  0x68   : > { %5516 = vmatprep.subr.mxu0 %v5853_v2  ;;  %5545 = vmatprep.subr.mxu1 %v5853_v2 }
  0x69   : > { %5348 = vmatmul.mubr.msk.f32.gmra.mrb[2].mxu1 %vm307_vm2, %v1231_v44  ;;  %5464 = vmatmul.mubr.msk.f32.gmra.mrb[2].mxu0 %vm307_vm2, %v1232_v47 }
  0x6a   : > { %5350 = vmatprep.mubr.msk.f32.mxu1 %vm5854_vm1, %v5853_v2  ;;  %5466 = vmatprep.mubr.msk.f32.mxu0 %vm5854_vm1, %v5853_v2 }
  0x6d   : > { %5351 = vmatmul.mubr.msk.f32.gmra.mrb[4].mxu1 %vm307_vm2, %v1232_v47  ;;  %5467 = vmatmul.mubr.msk.f32.gmra.mrb[4].mxu0 %vm307_vm2, %v1233_v48 }
  0x6e   : > { %5353 = vmatprep.mubr.msk.f32.mxu1 %vm5854_vm1, %v5853_v2  ;;  %5469 = vmatprep.mubr.msk.f32.mxu0 %vm5854_vm1, %v5853_v2 }
  0x71   : > { %5354 = vmatmul.mubr.msk.f32.gmra.mrb[6].mxu1 %vm307_vm2, %v1233_v48  ;;  %5470 = vmatmul.mubr.msk.f32.gmra.mrb[6].mxu0 %vm307_vm2, %v1234_v49 }
  0x72   : > { %5356 = vmatprep.mubr.msk.f32.mxu1 %vm5854_vm1, %v5853_v2  ;;  %5472 = vmatprep.mubr.msk.f32.mxu0 %vm5854_vm1, %v5853_v2 }
  0x75   : > { %5357 = vmatmul.mubr.msk.f32.gmra.mrb[8].mxu1 %vm307_vm2, %v1234_v49  ;;  %5473 = vmatmul.mubr.msk.f32.gmra.mrb[8].mxu0 %vm307_vm2, %v1235_v50 }
  0x76   : > { %5359 = vmatprep.mubr.msk.f32.mxu1 %vm5854_vm1, %v5853_v2  ;;  %5475 = vmatprep.mubr.msk.f32.mxu0 %vm5854_vm1, %v5853_v2 }
  0x79   : > { %5360 = vmatmul.mubr.msk.f32.gmra.mrb[10].mxu1 %vm307_vm2, %v1235_v50  ;;  %5476 = vmatmul.mubr.msk.f32.gmra.mrb[10].mxu0 %vm307_vm2, %v1236_v51 }
  0x7a   : > { %5362 = vmatprep.mubr.msk.f32.mxu1 %vm5854_vm1, %v5853_v2  ;;  %5478 = vmatprep.mubr.msk.f32.mxu0 %vm5854_vm1, %v5853_v2 }
  0x7d   : > { %5363 = vmatmul.mubr.msk.f32.gmra.mrb[12].mxu1 %vm307_vm2, %v1236_v51  ;;  %5479 = vmatmul.mubr.msk.f32.gmra.mrb[12].mxu0 %vm307_vm2, %v1237_v52 }
  0x7e   : > { %5365 = vmatprep.mubr.msk.f32.mxu1 %vm5854_vm1, %v5853_v2  ;;  %5481 = vmatprep.mubr.msk.f32.mxu0 %vm5854_vm1, %v5853_v2 }
  0x81   : > { %5366 = vmatmul.mubr.msk.f32.gmra.mrb[14].mxu1 %vm307_vm2, %v1237_v52  ;;  %5482 = vmatmul.mubr.msk.f32.gmra.mrb[14].mxu0 %vm307_vm2, %v1238_v53 }
  0x82   : > { %5368 = vmatprep.mubr.msk.f32.mxu1 %vm5854_vm1, %v5853_v2  ;;  %5484 = vmatprep.mubr.msk.f32.mxu0 %vm5854_vm1, %v5853_v2 }
  0x85   : > { %5369 = vmatmul.mubr.msk.f32.gmra.mrb[16].mxu1 %vm307_vm2, %v1238_v53  ;;  %5485 = vmatmul.mubr.msk.f32.gmra.mrb[16].mxu0 %vm307_vm2, %v1239_v54 }
  0x86   : > { %5373 = vmatprep.mubr.msk.f32.mxu1 %vm5854_vm1, %v5853_v2  ;;  %5489 = vmatprep.mubr.msk.f32.mxu0 %vm5854_vm1, %v5853_v2 }
  0x89   : > { %5374 = vmatmul.mubr.msk.f32.vlgmr.msra.gmra.mrb[0].mxu1 %vm307_vm2, %v5048_v55  ;;  %5490 = vmatmul.mubr.msk.f32.vlgmr.msra.gmra.mrb[0].mxu0 %vm307_vm2, %v5119_v56 }
  0x8a   : > { %5517 = vmatpush3.msk.msra.mxu0 %vm335_vm0, %v5139_v57  ;;  %5546 = vmatpush3.msk.msra.mxu1 %vm335_vm0, %v1711_v58 }
  0x8b   : > { %5376 = vmatprep.mubr.msk.f32.mxu1 %vm5854_vm1, %v5853_v2  ;;  %5492 = vmatprep.mubr.msk.f32.mxu0 %vm5854_vm1, %v5853_v2 }
  0x8d   : > { %5377 = vmatmul.mubr.msk.f32.gmra.mrb[2].mxu1 %vm307_vm2, %v5049_v59  ;;  %5493 = vmatmul.mubr.msk.f32.gmra.mrb[2].mxu0 %vm307_vm2, %v5120_v60 }
  0x8e   : > { %5379 = vmatprep.mubr.msk.f32.mxu1 %vm5854_vm1, %v5853_v2  ;;  %5495 = vmatprep.mubr.msk.f32.mxu0 %vm5854_vm1, %v5853_v2 }
  0x91   : > { %5380 = vmatmul.mubr.msk.f32.gmra.mrb[4].mxu1 %vm307_vm2, %v5050_v61  ;;  %5496 = vmatmul.mubr.msk.f32.gmra.mrb[4].mxu0 %vm307_vm2, %v5121_v62 }
  0x92   : > { %5382 = vmatprep.mubr.msk.f32.mxu1 %vm5854_vm1, %v5853_v2  ;;  %5498 = vmatprep.mubr.msk.f32.mxu0 %vm5854_vm1, %v5853_v2 }
  0x95   : > { %5383 = vmatmul.mubr.msk.f32.gmra.mrb[6].mxu1 %vm307_vm2, %v5051_v63  ;;  %5499 = vmatmul.mubr.msk.f32.gmra.mrb[6].mxu0 %vm307_vm2, %v5122_v0 }
  0x96   : > { %5385 = vmatprep.mubr.msk.f32.mxu1 %vm5854_vm1, %v5853_v2  ;;  %5501 = vmatprep.mubr.msk.f32.mxu0 %vm5854_vm1, %v5853_v2 }
  0x99   : > { %5386 = vmatmul.mubr.msk.f32.gmra.mrb[8].mxu1 %vm307_vm2, %v5052_v1  ;;  %5502 = vmatmul.mubr.msk.f32.gmra.mrb[8].mxu0 %vm307_vm2, %v5123_v3 }
  0x9a   : > { %5388 = vmatprep.mubr.msk.f32.mxu1 %vm5854_vm1, %v5853_v2  ;;  %5504 = vmatprep.mubr.msk.f32.mxu0 %vm5854_vm1, %v5853_v2 }
  0x9d   : > { %5389 = vmatmul.mubr.msk.f32.gmra.mrb[10].mxu1 %vm307_vm2, %v5053_v4  ;;  %5505 = vmatmul.mubr.msk.f32.gmra.mrb[10].mxu0 %vm307_vm2, %v5124_v5 }
  0x9e   : > { %5391 = vmatprep.mubr.msk.f32.mxu1 %vm5854_vm1, %v5853_v2  ;;  %5507 = vmatprep.mubr.msk.f32.mxu0 %vm5854_vm1, %v5853_v2 }
  0xa1   : > { %5392 = vmatmul.mubr.msk.f32.gmra.mrb[12].mxu1 %vm307_vm2, %v5054_v7  ;;  %5508 = vmatmul.mubr.msk.f32.gmra.mrb[12].mxu0 %vm307_vm2, %v5125_v9 }
  0xa2   : > { %5394 = vmatprep.mubr.msk.f32.mxu1 %vm5854_vm1, %v5853_v2  ;;  %5510 = vmatprep.mubr.msk.f32.mxu0 %vm5854_vm1, %v5853_v2 }
  0xa5   : > { %5395 = vmatmul.mubr.msk.f32.gmra.mrb[14].mxu1 %vm307_vm2, %v5055_v11  ;;  %5511 = vmatmul.mubr.msk.f32.gmra.mrb[14].mxu0 %vm307_vm2, %v5126_v13 }
  0xa6   : > { %5397 = vmatprep.mubr.msk.f32.mxu1 %vm5854_vm1, %v5853_v2  ;;  %5513 = vmatprep.mubr.msk.f32.mxu0 %vm5854_vm1, %v5853_v2 }
  0xa9   : > { %5398 = vmatmul.mubr.msk.f32.gmra.mrb[16].mxu1 %vm307_vm2, %v5056_v15  ;;  %5514 = vmatmul.mubr.msk.f32.gmra.mrb[16].mxu0 %vm307_vm2, %v5127_v17 }
  0xaa   : > { %5518 = vmatprep.mubr.msk.f32.mxu0 %vm5854_vm1, %v5853_v2  ;;  %5547 = vmatprep.mubr.msk.f32.mxu1 %vm5854_vm1, %v5853_v2 }
  0xad   : > { %5519 = vmatmul.mubr.msk.f32.vlgmr.msra.gmra.mrb[0].mxu0 %vm307_vm2, %v1551_v19  ;;  %5548 = vmatmul.mubr.msk.f32.vlgmr.msra.gmra.mrb[18].mxu1 %vm307_vm2, %v5975_v6  ;;  %v1553_v6 = vld [vmem:[%s5965_s17 + $0x1a] sm:$0xff] }
  0xae   : > { %5521 = vmatprep.mubr.msk.f32.mxu0 %vm5854_vm1, %v5853_v2  ;;  %5550 = vmatprep.mubr.msk.f32.mxu1 %vm5854_vm1, %v5853_v2 }
  0xb1   : > { %5522 = vmatmul.mubr.msk.f32.gmra.mrb[2].mxu0 %vm307_vm2, %v1552_v21  ;;  %5551 = vmatmul.mubr.msk.f32.gmra.mrb[20].mxu1 %vm307_vm2, %v5984_v8  ;;  %v1554_v8 = vld [vmem:[%s5965_s17 + $0x22] sm:$0xff] }
  0xb2   : > { %5524 = vmatprep.mubr.msk.f32.mxu0 %vm5854_vm1, %v5853_v2  ;;  %5553 = vmatprep.mubr.msk.f32.mxu1 %vm5854_vm1, %v5853_v2 }
  0xb5   : > { %5525 = vmatmul.mubr.msk.f32.gmra.mrb[4].mxu0 %vm307_vm2, %v1553_v6  ;;  %5554 = vmatmul.mubr.msk.f32.gmra.mrb[22].mxu1 %vm307_vm2, %v6001_v10  ;;  %v1555_v10 = vld [vmem:[%s5965_s17 + $0x2a] sm:$0xff] }
  0xb6   : > { %5527 = vmatprep.mubr.msk.f32.mxu0 %vm5854_vm1, %v5853_v2  ;;  %5556 = vmatprep.mubr.msk.f32.mxu1 %vm5854_vm1, %v5853_v2 }
  0xb9   : > { %5528 = vmatmul.mubr.msk.f32.gmra.mrb[6].mxu0 %vm307_vm2, %v1554_v8  ;;  %5557 = vmatmul.mubr.msk.f32.gmra.mrb[24].mxu1 %vm307_vm2, %v6012_v12  ;;  %v1556_v12 = vld [vmem:[%s5965_s17 + $0x32] sm:$0xff] }
  0xba   : > { %5530 = vmatprep.mubr.msk.f32.mxu0 %vm5854_vm1, %v5853_v2  ;;  %5559 = vmatprep.mubr.msk.f32.mxu1 %vm5854_vm1, %v5853_v2 }
  0xbd   : > { %5531 = vmatmul.mubr.msk.f32.gmra.mrb[8].mxu0 %vm307_vm2, %v1555_v10  ;;  %5560 = vmatmul.mubr.msk.f32.gmra.mrb[26].mxu1 %vm307_vm2, %v6023_v14  ;;  %v1557_v14 = vld [vmem:[%s5965_s17 + $0x3a] sm:$0xff] }
  0xbe   : > { %5533 = vmatprep.mubr.msk.f32.mxu0 %vm5854_vm1, %v5853_v2  ;;  %5562 = vmatprep.mubr.msk.f32.mxu1 %vm5854_vm1, %v5853_v2 }
  0xc1   : > { %5534 = vmatmul.mubr.msk.f32.gmra.mrb[10].mxu0 %vm307_vm2, %v1556_v12  ;;  %5563 = vmatmul.mubr.msk.f32.gmra.mrb[28].mxu1 %vm307_vm2, %v6034_v16  ;;  %v1559_v16 = vld [vmem:[%s5965_s17 + $0x4a] sm:$0xff]  ;;  %s5182_s17 = sshll.u32 %s5957_s13, 6  ;;  %s7196_s13 = sand.u32 1, %s5843_s22  }
  0xc2   : > { %5536 = vmatprep.mubr.msk.f32.mxu0 %vm5854_vm1, %v5853_v2  ;;  %5565 = vmatprep.mubr.msk.f32.mxu1 %vm5854_vm1, %v5853_v2  ;;  %s6476_s29 = scalar_lea.vmem %s7288_s3, %s5182_s17  ;;  %s6519_s11 = scalar_lea.vmem %s7289_s4, %s5182_s17 }
  0xc3   : > { %s5000_s12 = sshll.u32 %s7196_s13, 1  ;;  %s4818_s9 = scalar_lea.sflag [#allocation3], %s7196_s13 }
  0xc4   : > { %s262_s14 = scalar_lea.vmem [#allocation2], %s5000_s12  ;;  %s7202_s18 = scalar_lea.vmem [#allocation4], %s5000_s12 }
  0xc5   : > { %5537 = vmatmul.mubr.msk.f32.gmra.mrb[12].mxu0 %vm307_vm2, %v1557_v14  ;;  %5566 = vmatmul.mubr.msk.f32.gmra.mrb[30].mxu1 %vm307_vm2, %v6045_v18  ;;  %s4842_s16 = sshll.u32 %s262_s14, 4  ;;  %s4855_s19 = sshll.u32 %s7202_s18, 4  ;;  %s7212_s16 = int_to_ptr.vmem [resolvable:$true] %s4842_s16  ;;  %s7220_s19 = int_to_ptr.vmem [resolvable:$true] %s4855_s19 }
  0xc6   : > { %5539 = vmatprep.mubr.msk.f32.mxu0 %vm5854_vm1, %v5853_v2  ;;  %5568 = vmatprep.mubr.msk.f32.mxu1 %vm5854_vm1, %v5853_v2  ;;  %s5757_s10 = scalar_lea.vmem %s7212_s16, 32 }
  0xc7   : > { %p5758_p11 = scmp.ne.s32.totalorder %s7212_s16, %s5757_s10 }
  0xc9   : > { %5540 = vmatmul.mubr.msk.f32.gmra.mrb[14].mxu0 %vm307_vm2, %v1558_v23  ;;  %5569 = vmatmul.mubr.msk.f32.gmra.mrb[32].mxu1 %vm307_vm2, %v6056_v20  ;;  %p5759_p12 = pnand %p5758_p11, %p5931_p5 }
  0xca   : > { %5542 = vmatprep.mubr.msk.f32.mxu0 %vm5854_vm1, %v5853_v2  ;;  %5571 = vmatprep.mubr.msk.f32.mxu1 %vm5854_vm1, %v5853_v2 }
  0xcb   : > { %p5760_p13 = pneg %p5759_p12 }
  0xcd   : > { %5543 = vmatmul.mubr.msk.f32.gmra.mrb[16].mxu0 %vm307_vm2, %v1559_v16  ;;  %5572 = vmatmul.mubr.msk.f32.gmra.mrb[34].mxu1 %vm307_vm2, %v6067_v22 }
 0x15c   : > { %v857_v18 = vpop.f32.mrb[0].mxu1 }
 0x15d   : > { %v5375_v24 = vpop.f32.mrb[1].mxu1 }
 0x160   : > { %v6380_v25 = vpop.f32.mrb[2].mxu1 }
 0x161   : > { %v5378_v26 = vpop.f32.mrb[3].mxu1 }
 0x164   : > { %v6382_v27 = vpop.f32.mrb[4].mxu1 }
 0x165   : > { %v5381_v20 = vpop.f32.mrb[5].mxu1 }
 0x168   : > { %v6384_v28 = vpop.f32.mrb[6].mxu1 }
 0x169   : > { %v5384_v29 = vpop.f32.mrb[7].mxu1 }
 0x16c   : > { %v6386_v30 = vpop.f32.mrb[8].mxu1 }
 0x16d   : > { %v5387_v2 = vpop.f32.mrb[9].mxu1 }
 0x170   : > { %v6388_v31 = vpop.f32.mrb[10].mxu1 }
 0x171   : > { %v5390_v32 = vpop.f32.mrb[11].mxu1 }
 0x174   : > { %v6390_v33 = vpop.f32.mrb[12].mxu1 }
 0x175   : > { %v5393_v22 = vpop.f32.mrb[13].mxu1 }
 0x178   : > { %v6392_v37 = vpop.f32.mrb[14].mxu1 }
 0x179   : > { %v5396_v38 = vpop.f32.mrb[15].mxu1 }
 0x17c   : > { %v6394_v41 = vpop.f32.mrb[16].mxu1 }
 0x17d   : > { %v5399_v42 = vpop.f32.mrb[17].mxu1 }
 0x180   : > { %v1658_v44 = vpop.f32.mrb[0].mxu0  ;;  %v1781_v45 = vpop.f32.mrb[18].mxu1 }
 0x181   : > { %v5574_v46 = vadd.f32 %v1658_v44, %v857_v18  ;;  %v2344_v47 = vcombine.high %v1781_v45, %v1781_v45  ;;  %v2351_v48 = vrot.slane %v1781_v45, %v6396_v43  ;;  %v5520_v49 = vpop.f32.mrb[1].mxu0  ;;  %v5549_v50 = vpop.f32.mrb[19].mxu1 }
 0x183   : > { %v1834_v51 = vcombine.high %v5574_v46, %v5574_v46  ;;  %v1841_v52 = vrot.slane %v5574_v46, %v6396_v43  ;;  %v2358_v53 = vrot.slane %v2344_v47, %v6396_v43  ;;  %v2359_v54 = vcombine.high %v2351_v48, %v2351_v48 }
 0x184   : > { %v6402_v55 = vrot.slane %v2351_v48, %v6396_v43  ;;  %v6404_v56 = vpop.f32.mrb[2].mxu0  ;;  %v6406_v57 = vpop.f32.mrb[20].mxu1 }
 0x185   : > { %v1848_v58 = vrot.slane %v1834_v51, %v6396_v43  ;;  %v1849_v59 = vcombine.high %v1841_v52, %v1841_v52  ;;  %v1857_v60 = vrot.slane %v1841_v52, %v6396_v43  ;;  %v2360_v61 = vcombine.high %v2358_v53, %v2358_v53  ;;  %v5523_v62 = vpop.f32.mrb[3].mxu0  ;;  %v5552_v63 = vpop.f32.mrb[21].mxu1 }
 0x186   : > { %v6411_v0 = vrot.slane %v2358_v53, %v6396_v43  ;;  %v6414_v1 = vrot.slane %v2359_v54, %v6396_v43  ;;  %v6418_v3 = vcombine.high %v6402_v55, %v6402_v55  ;;  %v6422_v4 = vmul.f32 %v6402_v55, %v6402_v55 }
 0x187   : > { %v1850_v5 = vcombine.high %v1848_v58, %v1848_v58  ;;  %v1864_v7 = vrot.slane %v1848_v58, %v6396_v43  ;;  %v1871_v9 = vrot.slane %v1849_v59, %v6396_v43  ;;  %v1879_v11 = vcombine.high %v1857_v60, %v1857_v60 }
 0x188   : > { %v3685_v13 = vmul.f32 %v1857_v60, %v1857_v60  ;;  %v6427_v15 = vrot.slane %v2360_v61, %v6396_v43  ;;  %v6431_v17 = vcombine.high %v6411_v0, %v6411_v0  ;;  %v6435_v19 = vcombine.high %v6414_v1, %v6414_v1  ;;  %v6437_v21 = vpop.f32.mrb[4].mxu0  ;;  %v6439_v6 = vpop.f32.mrb[22].mxu1 }
 0x189   : > { %v1878_v8 = vrot.slane %v1850_v5, %v6396_v43  ;;  %v1880_v10 = vcombine.high %v1864_v7, %v1864_v7  ;;  %v1881_v12 = vcombine.high %v1871_v9, %v1871_v9  ;;  %v2845_v14 = vcombine.low %v1857_v60, %v1871_v9  ;;  %v5526_v23 = vpop.f32.mrb[5].mxu0  ;;  %v5555_v16 = vpop.f32.mrb[23].mxu1 }
 0x18a   : > { %v5160_v18 = vcombine.high %v1857_v60, %v1871_v9  ;;  %v3686_v24 = vmul.f32 %v1871_v9, %v1871_v9  ;;  %v3687_v26 = vmul.f32 %v1879_v11, %v1879_v11  ;;  %v3689_v20 = vmul.f32 %v1864_v7, %v1864_v7 }
 0x18b   : > { %v1882_v29 = vcombine.high %v1878_v8, %v1878_v8  ;;  %v2847_v2 = vcombine.low %v1864_v7, %v1878_v8  ;;  %v5161_v32 = vcombine.high %v1864_v7, %v1878_v8  ;;  %v2855_v22 = vrot.slane %v2845_v14, %v6396_v43 }
 0x18c   : > { %v2862_v34 = vrot.slane %v5160_v18, %v6396_v43  ;;  %v3688_v35 = vmul.f32 %v1881_v12, %v1881_v12  ;;  %v3690_v36 = vmul.f32 %v1878_v8, %v1878_v8  ;;  %v3691_v38 = vmul.f32 %v1880_v10, %v1880_v10  ;;  %v6444_v39 = vpop.f32.mrb[6].mxu0  ;;  %v6446_v40 = vpop.f32.mrb[24].mxu1 }
 0x18d   : > { %v2869_v42 = vrot.slane %v2847_v2, %v6396_v43  ;;  %v2876_v44 = vrot.slane %v5161_v32, %v6396_v43  ;;  %v3692_v45 = vmul.f32 %v1882_v29, %v1882_v29  ;;  %v3813_v46 = vcombine.low %v3685_v13, %v3686_v24  ;;  %v5529_v47 = vpop.f32.mrb[7].mxu0  ;;  %v5558_v48 = vpop.f32.mrb[25].mxu1 }
 0x18e   : > { %v2877_v49 = vcombine.low %v2855_v22, %v2862_v34  ;;  %v3814_v50 = vcombine.low %v3687_v26, %v3688_v35  ;;  %v3815_v51 = vcombine.low %v3689_v20, %v3690_v36  ;;  %v2392_v52 = vcombine.high %v6427_v15, %v6427_v15 }
 0x18f   : > { %v2878_v53 = vcombine.low %v2869_v42, %v2876_v44  ;;  %v3816_v54 = vcombine.low %v3691_v38, %v3692_v45  ;;  %v3823_v58 = vrot.slane %v3813_v46, %v6396_v43  ;;  %v3254_v59 = vcombine.low %v6402_v55, %v6414_v1 }
 0x190   : > { %v2885_v60 = vrot.slane %v2877_v49, %v6396_v43  ;;  %v3830_v61 = vrot.slane %v3814_v50, %v6396_v43  ;;  %v3837_v62 = vrot.slane %v3815_v51, %v6396_v43  ;;  %v5168_v63 = vcombine.high %v6402_v55, %v6414_v1  ;;  %v6460_v5 = vpop.f32.mrb[8].mxu0  ;;  %v6462_v7 = vpop.f32.mrb[26].mxu1 }
 0x191   : > { %v2892_v9 = vrot.slane %v2878_v53, %v6396_v43  ;;  %v3844_v11 = vrot.slane %v3816_v54, %v6396_v43  ;;  %v3256_v13 = vcombine.low %v6411_v0, %v6427_v15  ;;  %v5169_v8 = vcombine.high %v6411_v0, %v6427_v15  ;;  %v5532_v10 = vpop.f32.mrb[9].mxu0  ;;  %v5561_v12 = vpop.f32.mrb[27].mxu1 }
 0x192   : > { %v3845_v55 = vcombine.low %v3823_v58, %v3830_v61  ;;  %v3264_v14 = vrot.slane %v3254_v59, %v6396_v43  ;;  %v3271_v23 = vrot.slane %v5168_v63, %v6396_v43  ;;  %v4258_v16 = vmul.f32 %v6414_v1, %v6414_v1 }
 0x193   : > { %v6482_v18 = vcombine.low %v2885_v60, %v2892_v9  ;;  %v3846_v24 = vcombine.low %v3837_v62, %v3844_v11  ;;  %v3278_v26 = vrot.slane %v3256_v13, %v6396_v43  ;;  %v3285_v20 = vrot.slane %v5169_v8, %v6396_v43 }
 0x194   : > { %v6487_v29 = vrot.slane %v3845_v55, %v6396_v43  ;;  %v3286_v2 = vcombine.low %v3264_v14, %v3271_v23  ;;  %v4259_v32 = vmul.f32 %v6418_v3, %v6418_v3  ;;  %v4260_v22 = vmul.f32 %v6435_v19, %v6435_v19  ;;  %v6493_v34 = vpop.f32.mrb[10].mxu0  ;;  %v6495_v1 = vpop.f32.mrb[28].mxu1 }
 0x195   : > { %3246 = vst.msk [vmem:[%s6476_s29] sm:$0xff] %vm3245_vm3, %v6482_v18  ;;  %v6501_v35 = vrot.slane %v3846_v24, %v6396_v43  ;;  %v3287_v36 = vcombine.low %v3278_v26, %v3285_v20  ;;  %v4261_v38 = vmul.f32 %v6411_v0, %v6411_v0  ;;  %v4262_v3 = vmul.f32 %v6427_v15, %v6427_v15  ;;  %v5535_v42 = vpop.f32.mrb[11].mxu0  ;;  %v5564_v19 = vpop.f32.mrb[29].mxu1 }
 0x196   : > { %v3294_v44 = vrot.slane %v3286_v2, %v6396_v43  ;;  %v4263_v45 = vmul.f32 %v6431_v17, %v6431_v17  ;;  %v4264_v46 = vmul.f32 %v2392_v52, %v2392_v52  ;;  %v4385_v47 = vcombine.low %v6422_v4, %v4258_v16 }
 0x197   : > { %v3861_v48 = vcombine.low %v6487_v29, %v6501_v35  ;;  %v3301_v49 = vrot.slane %v3287_v36, %v6396_v43  ;;  %v4386_v50 = vcombine.low %v4259_v32, %v4260_v22  ;;  %v4387_v0 = vcombine.low %v4261_v38, %v4262_v3 }
 0x198   : > { %v4388_v15 = vcombine.low %v4263_v45, %v4264_v46  ;;  %v4395_v17 = vrot.slane %v4385_v47, %v6396_v43  ;;  %v5575_v4 = vadd.f32 %v6404_v56, %v6380_v25  ;;  %v2393_v51 = vcombine.high %v6406_v57, %v6406_v57  ;;  %v6526_v52 = vpop.f32.mrb[12].mxu0  ;;  %v6528_v53 = vpop.f32.mrb[30].mxu1 }
 0x199   : > { %v6530_v54 = vcombine.low %v3294_v44, %v3301_v49  ;;  %v4402_v58 = vrot.slane %v4386_v50, %v6396_v43  ;;  %v4409_v59 = vrot.slane %v4387_v0, %v6396_v43  ;;  %v2400_v60 = vrot.slane %v6406_v57, %v6396_v43  ;;  %v5538_v61 = vpop.f32.mrb[13].mxu0  ;;  %v5567_v62 = vpop.f32.mrb[31].mxu1 }
 0x19a   : > { %v4416_v25 = vrot.slane %v4388_v15, %v6396_v43  ;;  %v1883_v56 = vcombine.high %v5575_v4, %v5575_v4  ;;  %v1890_v63 = vrot.slane %v5575_v4, %v6396_v43  ;;  %v2407_v9 = vrot.slane %v2393_v51, %v6396_v43 }
 0x19b   : > { %3654 = vst.msk [vmem:[%s6519_s11] sm:$0xff] %vm3245_vm3, %v6530_v54  ;;  %v4417_v11 = vcombine.low %v4395_v17, %v4402_v58  ;;  %v2408_v13 = vcombine.high %v2400_v60, %v2400_v60  ;;  %v2416_v8 = vrot.slane %v2400_v60, %v6396_v43  ;;  %v6545_v10 = vadd.f32 %v6437_v21, %v6382_v27 }
 0x19c   : > { %v4418_v57 = vcombine.low %v4409_v59, %v4416_v25  ;;  %v1897_v12 = vrot.slane %v1883_v56, %v6396_v43  ;;  %v1898_v55 = vcombine.high %v1890_v63, %v1890_v63  ;;  %v1906_v14 = vrot.slane %v1890_v63, %v6396_v43  ;;  %v6549_v23 = vpop.f32.mrb[14].mxu0  ;;  %v6564_v45 = vpop.f32.mrb[32].mxu1 }
 0x19d   : > { %v6552_v16 = vrot.slane %v4417_v11, %v6396_v43  ;;  %v2423_v24 = vrot.slane %v2407_v9, %v6396_v43  ;;  %v5541_v26 = vpop.f32.mrb[15].mxu0  ;;  %v2409_v22 = vcombine.high %v2407_v9, %v2407_v9  ;;  %v2430_v36 = vrot.slane %v2408_v13, %v6396_v43  ;;  %v5570_v0 = vpop.f32.mrb[33].mxu1 }
 0x19e   : > { %v6556_v20 = vrot.slane %v4418_v57, %v6396_v43  ;;  %v1899_v2 = vcombine.high %v1897_v12, %v1897_v12  ;;  %v1913_v27 = vrot.slane %v1897_v12, %v6396_v43  ;;  %v1920_v21 = vrot.slane %v1898_v55, %v6396_v43 }
 0x19f   : > { %v1928_v32 = vcombine.high %v1906_v14, %v1906_v14  ;;  %v2438_v38 = vcombine.high %v2416_v8, %v2416_v8  ;;  %v2439_v50 = vcombine.high %v2423_v24, %v2423_v24  ;;  %v2437_v63 = vrot.slane %v2409_v22, %v6396_v43 }
 0x1a0   : > { %v4433_v3 = vcombine.low %v6552_v16, %v6556_v20  ;;  %v1927_v42 = vrot.slane %v1899_v2, %v6396_v43  ;;  %v1929_v19 = vcombine.high %v1913_v27, %v1913_v27  ;;  %v1930_v44 = vcombine.high %v1920_v21, %v1920_v21 }
 0x1a1   : > { %v2894_v46 = vcombine.low %v1920_v21, %v1928_v32  ;;  %v3693_v47 = vmul.f32 %v1920_v21, %v1920_v21  ;;  %v3694_v49 = vmul.f32 %v1928_v32, %v1928_v32  ;;  %v3696_v51 = vmul.f32 %v1913_v27, %v1913_v27 }
 0x1a2   : > { %v2895_v15 = vcombine.low %v1930_v44, %v1913_v27  ;;  %v2896_v17 = vcombine.low %v1927_v42, %v1929_v19  ;;  %v3695_v4 = vmul.f32 %v1930_v44, %v1930_v44  ;;  %v6566_v58 = vcombine.high %v1927_v42, %v1927_v42 }
 0x1a3   : > { %v3697_v59 = vmul.f32 %v1927_v42, %v1927_v42  ;;  %v3698_v60 = vmul.f32 %v1929_v19, %v1929_v19  ;;  %v3862_v61 = vcombine.low %v3693_v47, %v3694_v49  ;;  %v2904_v62 = vrot.slane %v2894_v46, %v6396_v43 }
 0x1a4   : > { %v2911_v25 = vrot.slane %v2895_v15, %v6396_v43  ;;  %v3863_v56 = vcombine.low %v3695_v4, %v3696_v51  ;;  %v6572_v9 = vrot.slane %v2896_v17, %v6396_v43  ;;  %v2440_v8 = vcombine.high %v2430_v36, %v2430_v36 }
 0x1a5   : > { %v3864_v11 = vcombine.low %v3697_v59, %v3698_v60  ;;  %v3872_v13 = vrot.slane %v3862_v61, %v6396_v43  ;;  %v3303_v55 = vcombine.low %v2430_v36, %v2438_v38  ;;  %v3305_v14 = vcombine.low %v2437_v63, %v2439_v50 }
 0x1a6   : > { %v2926_v57 = vcombine.low %v2904_v62, %v2911_v25  ;;  %v3879_v12 = vrot.slane %v3863_v56, %v6396_v43  ;;  %v6578_v26 = vmul.f32 %v6566_v58, %v6566_v58  ;;  %v3304_v2 = vcombine.low %v2440_v8, %v2423_v24 }
 0x1a7   : > { %v4265_v27 = vmul.f32 %v2430_v36, %v2430_v36  ;;  %v4266_v21 = vmul.f32 %v2438_v38, %v2438_v38  ;;  %v6581_v32 = vrot.slane %v3864_v11, %v6396_v43  ;;  %v6583_v42 = vcombine.high %v2437_v63, %v2437_v63 }
 0x1a8   : > { %v3894_v22 = vcombine.low %v3872_v13, %v3879_v12  ;;  %v3313_v19 = vrot.slane %v3303_v55, %v6396_v43  ;;  %v3320_v44 = vrot.slane %v3304_v2, %v6396_v43  ;;  %v4267_v46 = vmul.f32 %v2440_v8, %v2440_v8 }
 0x1a9   : > { %v4268_v47 = vmul.f32 %v2423_v24, %v2423_v24  ;;  %v4269_v49 = vmul.f32 %v2437_v63, %v2437_v63  ;;  %v2934_v0 = vrot.slane %v2926_v57, %v6396_v43  ;;  %v6589_v15 = vrot.slane %v3305_v14, %v6396_v43  ;;  %v6618_v14 = vpop.f32.mrb[16].mxu0 }
 0x1aa   : > { %v4270_v36 = vmul.f32 %v2439_v50, %v2439_v50  ;;  %v4434_v38 = vcombine.low %v4265_v27, %v4266_v21  ;;  %v3335_v17 = vcombine.low %v3313_v19, %v3320_v44  ;;  %v1932_v51 = vcombine.high %v6545_v10, %v6545_v10  ;;  %v5544_v19 = vpop.f32.mrb[17].mxu0 }
 0x1ab   : > { %v4435_v4 = vcombine.low %v4267_v46, %v4268_v47  ;;  %v1939_v59 = vrot.slane %v6545_v10, %v6396_v43  ;;  %v2442_v24 = vcombine.high %v6439_v6, %v6439_v6  ;;  %v2449_v62 = vrot.slane %v6439_v6, %v6396_v43 }
 0x1ac   : > { %v4436_v60 = vcombine.low %v4269_v49, %v4270_v36  ;;  %v4444_v61 = vrot.slane %v4434_v38, %v6396_v43  ;;  %v6601_v50 = vrot.slane %v3894_v22, %v6396_v43  ;;  %v1946_v56 = vrot.slane %v1932_v51, %v6396_v43 }
 0x1ad   : > { %v4451_v25 = vrot.slane %v4435_v4, %v6396_v43  ;;  %v1947_v63 = vcombine.high %v1939_v59, %v1939_v59  ;;  %v6606_v11 = vrot.slane %v3335_v17, %v6396_v43  ;;  %v6610_v10 = vmul.f32 %v6583_v42, %v6583_v42 }
 0x1ae   : > { %v1955_v13 = vrot.slane %v1939_v59, %v6396_v43  ;;  %v2456_v8 = vrot.slane %v2442_v24, %v6396_v43  ;;  %v1948_v57 = vcombine.high %v1946_v56, %v1946_v56  ;;  %v6615_v12 = vrot.slane %v1946_v56, %v6396_v43 }
 0x1af   : > { %v4466_v6 = vcombine.low %v4444_v61, %v4451_v25  ;;  %v1969_v55 = vrot.slane %v1947_v63, %v6396_v43  ;;  %v6621_v2 = vrot.slane %v4436_v60, %v6396_v43  ;;  %v2457_v22 = vcombine.high %v2449_v62, %v2449_v62 }
 0x1b0   : > { %v1977_v27 = vcombine.high %v1955_v13, %v1955_v13  ;;  %v2897_v21 = vcombine.low %v6566_v58, %v1955_v13  ;;  %v6625_v44 = vrot.slane %v1948_v57, %v6396_v43  ;;  %v3700_v47 = vmul.f32 %v1955_v13, %v1955_v13 }
 0x1b1   : > { %v1979_v46 = vcombine.high %v1969_v55, %v1969_v55  ;;  %v2458_v49 = vcombine.high %v2456_v8, %v2456_v8  ;;  %v6628_v36 = vrot.slane %v4466_v6, %v6396_v43  ;;  %v5162_v17 = vcombine.high %v1955_v13, %v1969_v55  ;;  %v6645_v55 = vpop.f32.mrb[34].mxu1 }
 0x1b2   : > { %v2925_v38 = vrot.slane %v2897_v21, %v6396_v43  ;;  %v3701_v4 = vmul.f32 %v1977_v27, %v1977_v27  ;;  %v2944_v51 = vcombine.low %v6615_v12, %v6625_v44  ;;  %v3703_v58 = vmul.f32 %v6615_v12, %v6615_v12 }
 0x1b3   : > { %v3702_v59 = vmul.f32 %v1979_v46, %v1979_v46  ;;  %v3704_v60 = vmul.f32 %v6625_v44, %v6625_v44  ;;  %v1978_v61 = vcombine.high %v6615_v12, %v6615_v12  ;;  %v1980_v24 = vcombine.high %v6625_v44, %v6625_v44 }
 0x1b4   : > { %v2927_v25 = vcombine.low %v6572_v9, %v2925_v38  ;;  %v3865_v56 = vcombine.low %v6578_v26, %v3700_v47  ;;  %v2953_v63 = vrot.slane %v5162_v17, %v6396_v43  ;;  %v2960_v13 = vrot.slane %v2944_v51, %v6396_v43  ;;  %v5573_v9 = vpop.f32.mrb[35].mxu1 }
 0x1b5   : > { %v3911_v6 = vcombine.low %v3701_v4, %v3702_v59  ;;  %v3912_v57 = vcombine.low %v3703_v58, %v3704_v60  ;;  %v2465_v19 = vrot.slane %v2449_v62, %v6396_v43  ;;  %v6651_v46 = vrot.slane %v2456_v8, %v6396_v43 }
 0x1b6   : > { %v2941_v27 = vrot.slane %v2927_v25, %v6396_v43  ;;  %v3893_v21 = vrot.slane %v3865_v56, %v6396_v43  ;;  %v2975_v26 = vcombine.low %v2953_v63, %v2960_v13  ;;  %v2479_v17 = vrot.slane %v2457_v22, %v6396_v43 }
 0x1b7   : > { %v3921_v47 = vrot.slane %v3911_v6, %v6396_v43  ;;  %v3928_v38 = vrot.slane %v3912_v57, %v6396_v43  ;;  %v6658_v59 = vrot.slane %v2458_v49, %v6396_v43  ;;  %v2487_v58 = vcombine.high %v2465_v19, %v2465_v19 }
 0x1b8   : > { %v2942_v4 = vcombine.low %v2934_v0, %v2941_v27  ;;  %v3895_v51 = vcombine.low %v6581_v32, %v3893_v21  ;;  %v3705_v60 = vmul.f32 %v1978_v61, %v1978_v61  ;;  %v3706_v62 = vmul.f32 %v1980_v24, %v1980_v24 }
 0x1b9   : > { %v3943_v25 = vcombine.low %v3921_v47, %v3928_v38  ;;  %v2489_v8 = vcombine.high %v2479_v17, %v2479_v17  ;;  %v2488_v63 = vcombine.high %v6651_v46, %v6651_v46  ;;  %v3306_v22 = vcombine.low %v6583_v42, %v2465_v19 }
 0x1ba   : > { %3247 = vst.msk [vmem:[%s6476_s29 + $0x8] sm:$0xff] %vm3245_vm3, %v2942_v4  ;;  %v3909_v56 = vrot.slane %v3895_v51, %v6396_v43  ;;  %v5170_v0 = vcombine.high %v2465_v19, %v2479_v17  ;;  %v2490_v32 = vcombine.high %v6658_v59, %v6658_v59  ;;  %v3353_v49 = vcombine.low %v6651_v46, %v6658_v59 }
 0x1bb   : > { %v4272_v61 = vmul.f32 %v2465_v19, %v2465_v19  ;;  %v4273_v24 = vmul.f32 %v2487_v58, %v2487_v58  ;;  %v6671_v13 = vrot.slane %v2975_v26, %v6396_v43  ;;  %v3334_v57 = vrot.slane %v3306_v22, %v6396_v43 }
 0x1bc   : > { %v3910_v6 = vcombine.low %v6601_v50, %v3909_v56  ;;  %v4274_v27 = vmul.f32 %v2489_v8, %v2489_v8  ;;  %v6676_v21 = vrot.slane %v3943_v25, %v6396_v43  ;;  %v6679_v42 = vrot.slane %v3353_v49, %v6396_v43 }
 0x1bd   : > { %v4275_v9 = vmul.f32 %v6651_v46, %v6651_v46  ;;  %v4276_v19 = vmul.f32 %v6658_v59, %v6658_v59  ;;  %v3336_v26 = vcombine.low %v6589_v15, %v3334_v57  ;;  %v3362_v47 = vrot.slane %v5170_v0, %v6396_v43 }
 0x1be   : > { %v4437_v50 = vcombine.low %v6610_v10, %v4272_v61  ;;  %v4483_v38 = vcombine.low %v4273_v24, %v4274_v27  ;;  %v6688_v17 = vmul.f32 %v2488_v63, %v2488_v63  ;;  %v6690_v51 = vmul.f32 %v2490_v32, %v2490_v32 }
 0x1bf   : > { %v4484_v58 = vcombine.low %v4275_v9, %v4276_v19  ;;  %v5577_v25 = vadd.f32 %v6444_v39, %v6384_v28  ;;  %v3350_v8 = vrot.slane %v3336_v26, %v6396_v43  ;;  %v5163_v10 = vcombine.high %v6615_v12, %v6625_v44 }
 0x1c0   : > { %v4465_v56 = vrot.slane %v4437_v50, %v6396_v43  ;;  %v6697_v15 = vrot.slane %v4483_v38, %v6396_v43  ;;  %v3384_v63 = vcombine.low %v3362_v47, %v6679_v42  ;;  %v3662_v49 = vsel %vm3245_vm3, %v6482_v18, 0.0 }
 0x1c1   : > { %v6703_v22 = vrot.slane %v4484_v58, %v6396_v43  ;;  %v1981_v0 = vcombine.high %v5577_v25, %v5577_v25  ;;  %v1988_v32 = vrot.slane %v5577_v25, %v6396_v43  ;;  %v6707_v28 = vcombine.low %v6606_v11, %v3350_v8 }
 0x1c2   : > { %v4467_v39 = vcombine.low %v6621_v2, %v4465_v56  ;;  %v3663_v61 = vsel %vm3245_vm3, %v2942_v4, 0.0  ;;  %v2967_v2 = vrot.slane %v5163_v10, %v6396_v43  ;;  %v3913_v18 = vcombine.low %v3705_v60, %v3706_v62 }
 0x1c3   : > { %v4515_v12 = vcombine.low %v6697_v15, %v6703_v22  ;;  %v1995_v44 = vrot.slane %v1981_v0, %v6396_v43  ;;  %v1996_v24 = vcombine.high %v1988_v32, %v1988_v32  ;;  %v2004_v57 = vrot.slane %v1988_v32, %v6396_v43  ;;  %3655 = vst.msk [vmem:[%s6519_s11 + $0x8] sm:$0xff] %vm3245_vm3, %v6707_v28 }
 0x1c4   : > { %v6721_v11 = vrot.slane %v4467_v39, %v6396_v43  ;;  %v3664_v27 = vadd.f32 %v3663_v61, %v3662_v49  ;;  %v4213_v19 = vsel %vm3245_vm3, %v3861_v48, 0.0  ;;  %v3935_v50 = vrot.slane %v3913_v18, %v6396_v43 }
 0x1c5   : > { %v1997_v42 = vcombine.high %v1995_v44, %v1995_v44  ;;  %v2011_v4 = vrot.slane %v1995_v44, %v6396_v43  ;;  %v2018_v9 = vrot.slane %v1996_v24, %v6396_v43  ;;  %v3707_v47 = vmul.f32 %v2004_v57, %v2004_v57 }
 0x1c6   : > { %v4482_v26 = vcombine.low %v6628_v36, %v6721_v11  ;;  %v4214_v38 = vsel %vm3245_vm3, %v3910_v6, 0.0  ;;  %v2491_v29 = vcombine.high %v6446_v40, %v6446_v40  ;;  %v2498_v39 = vrot.slane %v6446_v40, %v6396_v43 }
 0x1c7   : > { %v6735_v60 = vrot.slane %v1997_v42, %v6396_v43  ;;  %v2026_v62 = vcombine.high %v2011_v4, %v2011_v4  ;;  %v2027_v58 = vcombine.high %v2018_v9, %v2018_v9  ;;  %v2946_v25 = vcombine.low %v2004_v57, %v2018_v9 }
 0x1c8   : > { %v3708_v8 = vmul.f32 %v2018_v9, %v2018_v9  ;;  %v3710_v56 = vmul.f32 %v2011_v4, %v2011_v4  ;;  %v4215_v15 = vadd.f32 %v4214_v38, %v4213_v19  ;;  %v2505_v42 = vrot.slane %v2491_v29, %v6396_v43 }
 0x1c9   : > { %v2974_v35 = vrot.slane %v2946_v25, %v6396_v43  ;;  %v2992_v48 = vcombine.low %v2027_v58, %v2011_v4  ;;  %v2993_v10 = vcombine.low %v6735_v60, %v2026_v62  ;;  %v3709_v22 = vmul.f32 %v2027_v58, %v2027_v58 }
 0x1ca   : > { %v3711_v6 = vmul.f32 %v6735_v60, %v6735_v60  ;;  %v3712_v0 = vmul.f32 %v2026_v62, %v2026_v62  ;;  %v3914_v32 = vcombine.low %v3707_v47, %v3708_v8  ;;  %v2506_v4 = vcombine.high %v2498_v39, %v2498_v39 }
 0x1cb   : > { %v2976_v49 = vcombine.low %v2967_v2, %v2974_v35  ;;  %v3002_v61 = vrot.slane %v2992_v48, %v6396_v43  ;;  %v3009_v44 = vrot.slane %v2993_v10, %v6396_v43  ;;  %v3960_v24 = vcombine.low %v3709_v22, %v3710_v56 }
 0x1cc   : > { %v3942_v57 = vrot.slane %v3914_v32, %v6396_v43  ;;  %v3961_v18 = vcombine.low %v3711_v6, %v3712_v0  ;;  %v3392_v9 = vrot.slane %v3384_v63, %v6396_v43  ;;  %v2514_v40 = vrot.slane %v2498_v39, %v6396_v43 }
 0x1cd   : > { %v2990_v19 = vrot.slane %v2976_v49, %v6396_v43  ;;  %v3970_v47 = vrot.slane %v3960_v24, %v6396_v43  ;;  %v2507_v62 = vcombine.high %v2505_v42, %v2505_v42  ;;  %v2521_v58 = vrot.slane %v2505_v42, %v6396_v43 }
 0x1ce   : > { %v3944_v2 = vcombine.low %v3935_v50, %v3942_v57  ;;  %v3977_v38 = vrot.slane %v3961_v18, %v6396_v43  ;;  %v3024_v8 = vcombine.low %v3002_v61, %v3009_v44  ;;  %v2528_v56 = vrot.slane %v2506_v4, %v6396_v43 }
 0x1cf   : > { %v2991_v25 = vcombine.low %v6671_v13, %v2990_v19  ;;  %v5171_v63 = vcombine.high %v6651_v46, %v6658_v59  ;;  %v2535_v48 = vrot.slane %v2507_v62, %v6396_v43  ;;  %v2536_v10 = vcombine.high %v2521_v58, %v2521_v58 }
 0x1d0   : > { %v3958_v29 = vrot.slane %v3944_v2, %v6396_v43  ;;  %v3992_v35 = vcombine.low %v3970_v47, %v3977_v38  ;;  %v6762_v50 = vrot.slane %v4515_v12, %v6396_v43  ;;  %v2537_v13 = vcombine.high %v2528_v56, %v2528_v56 }
 0x1d1   : > { %3248 = vst.msk [vmem:[%s6476_s29 + $0x10] sm:$0xff] %vm3245_vm3, %v2991_v25  ;;  %v3665_v22 = vsel %vm3245_vm3, %v2991_v25, 0.0  ;;  %v3355_v6 = vcombine.low %v2514_v40, %v2528_v56  ;;  %v3376_v46 = vrot.slane %v5171_v63, %v6396_v43  ;;  %v3402_v59 = vcombine.low %v2535_v48, %v2536_v10 }
 0x1d2   : > { %v6767_v0 = vadd.f32 %v3665_v22, %v3664_v27  ;;  %v3959_v32 = vcombine.low %v6676_v21, %v3958_v29  ;;  %v3401_v49 = vcombine.low %v2537_v13, %v2521_v58  ;;  %v4235_v12 = vsel %vm3245_vm3, %v6530_v54, 0.0 }
 0x1d3   : > { %v3383_v39 = vrot.slane %v3355_v6, %v6396_v43  ;;  %v4236_v61 = vsel %vm3245_vm3, %v6707_v28, 0.0  ;;  %v6777_v44 = vrot.slane %v3024_v8, %v6396_v43  ;;  %v4279_v57 = vmul.f32 %v2514_v40, %v2514_v40 }
 0x1d4   : > { %v4216_v27 = vsel %vm3245_vm3, %v3959_v32, 0.0  ;;  %v4237_v24 = vadd.f32 %v4236_v61, %v4235_v12  ;;  %v6783_v42 = vrot.slane %v3402_v59, %v6396_v43  ;;  %v4280_v4 = vmul.f32 %v2528_v56, %v2528_v56 }
 0x1d5   : > { %v6780_v21 = vadd.f32 %v4216_v27, %v4215_v15  ;;  %v3385_v18 = vcombine.low %v3376_v46, %v3383_v39  ;;  %v4281_v19 = vmul.f32 %v2537_v13, %v2537_v13  ;;  %v4282_v47 = vmul.f32 %v2521_v58, %v2521_v58 }
 0x1d6   : > { %v4283_v54 = vmul.f32 %v2535_v48, %v2535_v48  ;;  %v4284_v2 = vmul.f32 %v2536_v10, %v2536_v10  ;;  %v6787_v38 = vrot.slane %v3401_v49, %v6396_v43  ;;  %v4485_v40 = vcombine.low %v6688_v17, %v6690_v51 }
 0x1d7   : > { %v3399_v28 = vrot.slane %v3385_v18, %v6396_v43  ;;  %v4486_v15 = vcombine.low %v4279_v57, %v4280_v4  ;;  %v6792_v62 = vrot.slane %v3992_v35, %v6396_v43  ;;  %v4532_v25 = vcombine.low %v4281_v19, %v4282_v47 }
 0x1d8   : > { %v4533_v8 = vcombine.low %v4283_v54, %v4284_v2  ;;  %v4786_v58 = vsel %vm3245_vm3, %v4482_v26, 0.0  ;;  %v4507_v63 = vrot.slane %v4485_v40, %v6396_v43  ;;  %v4785_v17 = vsel %vm3245_vm3, %v4433_v3, 0.0 }
 0x1d9   : > { %v3400_v56 = vcombine.low %v3392_v9, %v3399_v28  ;;  %v4514_v29 = vrot.slane %v4486_v15, %v6396_v43  ;;  %v6805_v51 = vrot.slane %v4532_v25, %v6396_v43  ;;  %v4787_v10 = vadd.f32 %v4786_v58, %v4785_v17 }
 0x1da   : > { %v6808_v35 = vrot.slane %v4533_v8, %v6396_v43  ;;  %v5578_v36 = vadd.f32 %v6460_v5, %v6386_v30  ;;  %v3433_v11 = vcombine.low %v6787_v38, %v6783_v42  ;;  %v2028_v20 = vcombine.high %v6735_v60, %v6735_v60 }
 0x1db   : > { %3656 = vst.msk [vmem:[%s6519_s11 + $0x10] sm:$0xff] %vm3245_vm3, %v3400_v56  ;;  %v4238_v26 = vsel %vm3245_vm3, %v3400_v56, 0.0  ;;  %v4516_v16 = vcombine.low %v4507_v63, %v4514_v29  ;;  %v6825_v5 = vcombine.high %v2535_v48, %v2535_v48  ;;  %v2539_v6 = vcombine.high %v6462_v7, %v6462_v7 }
 0x1dc   : > { %v6819_v3 = vadd.f32 %v4238_v26, %v4237_v24  ;;  %v4564_v9 = vcombine.low %v6805_v51, %v6808_v35  ;;  %v2029_v22 = vcombine.high %v5578_v36, %v5578_v36  ;;  %v2036_v13 = vrot.slane %v5578_v36, %v6396_v43 }
 0x1dd   : > { %v4530_v30 = vrot.slane %v4516_v16, %v6396_v43  ;;  %v2546_v32 = vrot.slane %v6462_v7, %v6396_v43  ;;  %v3713_v39 = vmul.f32 %v2028_v20, %v2028_v20  ;;  %v2553_v12 = vrot.slane %v2539_v6, %v6396_v43 }
 0x1de   : > { %v2043_v60 = vrot.slane %v2029_v22, %v6396_v43  ;;  %v2044_v46 = vcombine.high %v2036_v13, %v2036_v13  ;;  %v2052_v59 = vrot.slane %v2036_v13, %v6396_v43 }
 0x1df   : > { %v4531_v49 = vcombine.low %v6762_v50, %v4530_v30  ;;  %v2554_v61 = vcombine.high %v2546_v32, %v2546_v32  ;;  %v6836_v48 = vrot.slane %v2546_v32, %v6396_v43  ;;  %v2555_v19 = vcombine.high %v2553_v12, %v2553_v12 }
 0x1e0   : > { %v2045_v27 = vcombine.high %v2043_v60, %v2043_v60  ;;  %v2059_v24 = vrot.slane %v2043_v60, %v6396_v43  ;;  %v2066_v57 = vrot.slane %v2044_v46, %v6396_v43  ;;  %v2074_v7 = vcombine.high %v2052_v59, %v2052_v59 }
 0x1e1   : > { %v4788_v18 = vsel %vm3245_vm3, %v4531_v49, 0.0  ;;  %v2994_v42 = vcombine.low %v2028_v20, %v2052_v59  ;;  %v3714_v4 = vmul.f32 %v2052_v59, %v2052_v59  ;;  %v2569_v6 = vrot.slane %v2553_v12, %v6396_v43 }
 0x1e2   : > { %v6841_v47 = vadd.f32 %v4788_v18, %v4787_v10  ;;  %v2073_v50 = vrot.slane %v2045_v27, %v6396_v43  ;;  %v2075_v54 = vcombine.high %v2059_v24, %v2059_v24  ;;  %v2995_v2 = vcombine.low %v2066_v57, %v2074_v7 }
 0x1e3   : > { %v3016_v28 = vrot.slane %v2994_v42, %v6396_v43  ;;  %v3715_v38 = vmul.f32 %v2066_v57, %v2066_v57  ;;  %v3716_v40 = vmul.f32 %v2074_v7, %v2074_v7  ;;  %v3717_v15 = vmul.f32 %v2059_v24, %v2059_v24 }
 0x1e4   : > { %v2076_v25 = vcombine.high %v2073_v50, %v2073_v50  ;;  %v3023_v8 = vrot.slane %v2995_v2, %v6396_v43  ;;  %v3041_v58 = vcombine.low %v2059_v24, %v2073_v50  ;;  %v5164_v56 = vcombine.high %v2059_v24, %v2073_v50 }
 0x1e5   : > { %v3718_v63 = vmul.f32 %v2073_v50, %v2073_v50  ;;  %v3719_v29 = vmul.f32 %v2075_v54, %v2075_v54  ;;  %v3962_v17 = vcombine.low %v3713_v39, %v3714_v4  ;;  %v3963_v36 = vcombine.low %v3715_v38, %v3716_v40 }
 0x1e6   : > { %v3025_v10 = vcombine.low %v3016_v28, %v3023_v8  ;;  %v3051_v26 = vrot.slane %v3041_v58, %v6396_v43  ;;  %v3058_v16 = vrot.slane %v5164_v56, %v6396_v43  ;;  %v3720_v20 = vmul.f32 %v2076_v25, %v2076_v25 }
 0x1e7   : > { %v3984_v22 = vrot.slane %v3962_v17, %v6396_v43  ;;  %v3991_v13 = vrot.slane %v3963_v36, %v6396_v43  ;;  %v4009_v30 = vcombine.low %v3717_v15, %v3718_v63  ;;  %v3441_v32 = vrot.slane %v3433_v11, %v6396_v43 }
 0x1e8   : > { %v3039_v60 = vrot.slane %v3025_v10, %v6396_v43  ;;  %v4010_v46 = vcombine.low %v3719_v29, %v3720_v20  ;;  %v2576_v59 = vrot.slane %v2554_v61, %v6396_v43  ;;  %v3073_v39 = vcombine.low %v3051_v26, %v3058_v16 }
 0x1e9   : > { %v3993_v49 = vcombine.low %v3984_v22, %v3991_v13  ;;  %v2583_v27 = vrot.slane %v2555_v19, %v6396_v43  ;;  %v2584_v24 = vcombine.high %v6836_v48, %v6836_v48  ;;  %v4019_v7 = vrot.slane %v4009_v30, %v6396_v43 }
 0x1ea   : > { %v3040_v57 = vcombine.low %v6777_v44, %v3039_v60  ;;  %v4026_v12 = vrot.slane %v4010_v46, %v6396_v43  ;;  %v2585_v11 = vcombine.high %v2569_v6, %v2569_v6  ;;  %v3403_v61 = vcombine.low %v6825_v5, %v6836_v48 }
 0x1eb   : > { %v4007_v18 = vrot.slane %v3993_v49, %v6396_v43  ;;  %v2586_v42 = vcombine.high %v2583_v27, %v2583_v27  ;;  %v3404_v4 = vcombine.low %v2576_v59, %v2584_v24  ;;  %v3450_v54 = vcombine.low %v2569_v6, %v2583_v27 }
 0x1ec   : > { %3249 = vst.msk [vmem:[%s6476_s29 + $0x18] sm:$0xff] %vm3245_vm3, %v3040_v57  ;;  %v3667_v19 = vsel %vm3245_vm3, %v3040_v57, 0.0  ;;  %v4041_v50 = vcombine.low %v4019_v7, %v4026_v12  ;;  %v5172_v2 = vcombine.high %v2569_v6, %v2583_v27  ;;  %v3425_v38 = vrot.slane %v3403_v61, %v6396_v43 }
 0x1ed   : > { %v6867_v44 = vadd.f32 %v3667_v19, %v6767_v0  ;;  %v4008_v28 = vcombine.low %v6792_v62, %v4007_v18  ;;  %v3432_v40 = vrot.slane %v3404_v4, %v6396_v43  ;;  %v4572_v15 = vrot.slane %v4564_v9, %v6396_v43 }
 0x1ee   : > { %v3460_v25 = vrot.slane %v3450_v54, %v6396_v43  ;;  %v3467_v8 = vrot.slane %v5172_v2, %v6396_v43  ;;  %v4285_v58 = vmul.f32 %v6825_v5, %v6825_v5  ;;  %v4286_v62 = vmul.f32 %v6836_v48, %v6836_v48 }
 0x1ef   : > { %v4218_v0 = vsel %vm3245_vm3, %v4008_v28, 0.0  ;;  %v3434_v56 = vcombine.low %v3425_v38, %v3432_v40  ;;  %v4287_v63 = vmul.f32 %v2576_v59, %v2576_v59  ;;  %v6884_v29 = vrot.slane %v3073_v39, %v6396_v43 }
 0x1f0   : > { %v6887_v51 = vadd.f32 %v4218_v0, %v6780_v21  ;;  %v4288_v35 = vmul.f32 %v2584_v24, %v2584_v24  ;;  %v4289_v9 = vmul.f32 %v2569_v6, %v2569_v6  ;;  %v4290_v36 = vmul.f32 %v2583_v27, %v2583_v27 }
 0x1f1   : > { %v3448_v17 = vrot.slane %v3434_v56, %v6396_v43  ;;  %v4291_v5 = vmul.f32 %v2585_v11, %v2585_v11  ;;  %v4292_v10 = vmul.f32 %v2586_v42, %v2586_v42  ;;  %v3482_v26 = vcombine.low %v3460_v25, %v3467_v8 }
 0x1f2   : > { %v4534_v16 = vcombine.low %v4285_v58, %v4286_v62  ;;  %v4535_v20 = vcombine.low %v4287_v63, %v4288_v35  ;;  %v5579_v48 = vadd.f32 %v6493_v34, %v6388_v31  ;;  %v4581_v13 = vcombine.low %v4289_v9, %v4290_v36 }
 0x1f3   : > { %v3449_v22 = vcombine.low %v3441_v32, %v3448_v17  ;;  %v4582_v30 = vcombine.low %v4291_v5, %v4292_v10  ;;  %v2587_v21 = vcombine.high %v6495_v1, %v6495_v1  ;;  %v2594_v34 = vrot.slane %v6495_v1, %v6396_v43 }
 0x1f4   : > { %v4556_v6 = vrot.slane %v4534_v16, %v6396_v43  ;;  %v4563_v60 = vrot.slane %v4535_v20, %v6396_v43  ;;  %v2077_v46 = vcombine.high %v5579_v48, %v5579_v48  ;;  %v2084_v59 = vrot.slane %v5579_v48, %v6396_v43 }
 0x1f5   : > { %3657 = vst.msk [vmem:[%s6519_s11 + $0x18] sm:$0xff] %vm3245_vm3, %v3449_v22  ;;  %v4240_v39 = vsel %vm3245_vm3, %v3449_v22, 0.0  ;;  %v4591_v49 = vrot.slane %v4581_v13, %v6396_v43  ;;  %v4598_v31 = vrot.slane %v4582_v30, %v6396_v43  ;;  %v6909_v7 = vrot.slane %v4041_v50, %v6396_v43 }
 0x1f6   : > { %v6905_v32 = vadd.f32 %v4240_v39, %v6819_v3  ;;  %v4565_v27 = vcombine.low %v4556_v6, %v4563_v60  ;;  %v2091_v24 = vrot.slane %v2077_v46, %v6396_v43  ;;  %v2092_v57 = vcombine.high %v2084_v59, %v2084_v59 }
 0x1f7   : > { %v6912_v12 = vrot.slane %v3482_v26, %v6396_v43  ;;  %v4613_v11 = vcombine.low %v4591_v49, %v4598_v31  ;;  %v2100_v18 = vrot.slane %v2084_v59, %v6396_v43  ;;  %v2601_v54 = vrot.slane %v2587_v21, %v6396_v43 }
 0x1f8   : > { %v4579_v42 = vrot.slane %v4565_v27, %v6396_v43  ;;  %v2093_v61 = vcombine.high %v2091_v24, %v2091_v24  ;;  %v2107_v1 = vrot.slane %v2091_v24, %v6396_v43  ;;  %v2114_v3 = vrot.slane %v2092_v57, %v6396_v43 }
 0x1f9   : > { %v2122_v4 = vcombine.high %v2100_v18, %v2100_v18  ;;  %v3721_v19 = vmul.f32 %v2100_v18, %v2100_v18  ;;  %v2602_v2 = vcombine.high %v2594_v34, %v2594_v34  ;;  %v6927_v5 = vrot.slane %v4613_v11, %v6396_v43 }
 0x1fa   : > { %v4580_v50 = vcombine.low %v4572_v15, %v4579_v42  ;;  %v2121_v28 = vrot.slane %v2093_v61, %v6396_v43  ;;  %v2123_v38 = vcombine.high %v2107_v1, %v2107_v1  ;;  %v2124_v40 = vcombine.high %v2114_v3, %v2114_v3 }
 0x1fb   : > { %v3043_v25 = vcombine.low %v2100_v18, %v2114_v3  ;;  %v5165_v8 = vcombine.high %v2100_v18, %v2114_v3  ;;  %v3722_v58 = vmul.f32 %v2114_v3, %v2114_v3  ;;  %v3723_v0 = vmul.f32 %v2122_v4, %v2122_v4 }
 0x1fc   : > { %v4790_v56 = vsel %vm3245_vm3, %v4580_v50, 0.0  ;;  %v3090_v62 = vcombine.low %v2121_v28, %v2123_v38  ;;  %v3724_v63 = vmul.f32 %v2124_v40, %v2124_v40  ;;  %v3725_v35 = vmul.f32 %v2121_v28, %v2121_v28 }
 0x1fd   : > { %v6922_v9 = vadd.f32 %v4790_v56, %v6841_v47  ;;  %v3065_v17 = vrot.slane %v3043_v25, %v6396_v43  ;;  %v3072_v15 = vrot.slane %v5165_v8, %v6396_v43  ;;  %v3726_v36 = vmul.f32 %v2123_v38, %v2123_v38 }
 0x1fe   : > { %v4011_v10 = vcombine.low %v3721_v19, %v3722_v58  ;;  %v4012_v26 = vcombine.low %v3723_v0, %v3724_v63  ;;  %v2610_v16 = vrot.slane %v2594_v34, %v6396_v43  ;;  %v2603_v48 = vcombine.high %v2601_v54, %v2601_v54 }
 0x1ff   : > { %v3074_v20 = vcombine.low %v3065_v17, %v3072_v15  ;;  %v2617_v22 = vrot.slane %v2601_v54, %v6396_v43  ;;  %v2624_v13 = vrot.slane %v2602_v2, %v6396_v43  ;;  %v6933_v47 = vrot.slane %v3090_v62, %v6396_v43 }
 0x200   : > { %v4033_v30 = vrot.slane %v4011_v10, %v6396_v43  ;;  %v4040_v21 = vrot.slane %v4012_v26, %v6396_v43  ;;  %v2632_v6 = vcombine.high %v2610_v16, %v2610_v16  ;;  %v4058_v46 = vcombine.low %v3725_v35, %v3726_v36 }
 0x201   : > { %v3088_v60 = vrot.slane %v3074_v20, %v6396_v43  ;;  %v2633_v59 = vcombine.high %v2617_v22, %v2617_v22  ;;  %v2634_v39 = vcombine.high %v2624_v13, %v2624_v13  ;;  %v3452_v31 = vcombine.low %v2610_v16, %v2624_v13 }
 0x202   : > { %v4042_v49 = vcombine.low %v4033_v30, %v4040_v21  ;;  %v5173_v34 = vcombine.high %v2610_v16, %v2624_v13  ;;  %v4293_v27 = vmul.f32 %v2610_v16, %v2610_v16  ;;  %v2631_v57 = vrot.slane %v2603_v48, %v6396_v43 }
 0x203   : > { %v3089_v24 = vcombine.low %v6884_v29, %v3088_v60  ;;  %v4294_v11 = vmul.f32 %v2624_v13, %v2624_v13  ;;  %v4295_v18 = vmul.f32 %v2632_v6, %v2632_v6  ;;  %v3474_v61 = vrot.slane %v3452_v31, %v6396_v43 }
 0x204   : > { %v6941_v42 = vrot.slane %v4042_v49, %v6396_v43  ;;  %v3481_v1 = vrot.slane %v5173_v34, %v6396_v43  ;;  %v4296_v3 = vmul.f32 %v2634_v39, %v2634_v39  ;;  %v3499_v19 = vcombine.low %v2631_v57, %v2633_v59 }
 0x205   : > { %3250 = vst.msk [vmem:[%s6476_s29 + $0x20] sm:$0xff] %vm3245_vm3, %v3089_v24  ;;  %v3669_v4 = vsel %vm3245_vm3, %v3089_v24, 0.0  ;;  %v4297_v54 = vmul.f32 %v2631_v57, %v2631_v57  ;;  %v4298_v2 = vmul.f32 %v2633_v59, %v2633_v59  ;;  %v4583_v38 = vcombine.low %v4293_v27, %v4294_v11 }
 0x206   : > { %v4057_v29 = vcombine.low %v6909_v7, %v6941_v42  ;;  %v3483_v50 = vcombine.low %v3474_v61, %v3481_v1  ;;  %v4584_v40 = vcombine.low %v4295_v18, %v4296_v3  ;;  %v5580_v8 = vadd.f32 %v6526_v52, %v6390_v33 }
 0x207   : > { %v4630_v25 = vcombine.low %v4297_v54, %v4298_v2  ;;  %v2125_v58 = vcombine.high %v2121_v28, %v2121_v28  ;;  %v6953_v0 = vadd.f32 %v3669_v4, %v6867_v44  ;;  %v4605_v62 = vrot.slane %v4583_v38, %v6396_v43 }
 0x208   : > { %v3497_v56 = vrot.slane %v3483_v50, %v6396_v43  ;;  %v4612_v63 = vrot.slane %v4584_v40, %v6396_v43  ;;  %v6958_v35 = vcombine.high %v2631_v57, %v2631_v57  ;;  %v6961_v17 = vrot.slane %v4058_v46, %v6396_v43 }
 0x209   : > { %v6964_v15 = vrot.slane %v3499_v19, %v6396_v43  ;;  %v2126_v33 = vcombine.high %v5580_v8, %v5580_v8  ;;  %v2133_v52 = vrot.slane %v5580_v8, %v6396_v43  ;;  %v2636_v36 = vcombine.high %v6528_v53, %v6528_v53 }
 0x20a   : > { %v3498_v44 = vcombine.low %v6912_v12, %v3497_v56  ;;  %v4614_v28 = vcombine.low %v4605_v62, %v4612_v63  ;;  %v2643_v10 = vrot.slane %v6528_v53, %v6396_v43  ;;  %v6973_v26 = vrot.slane %v4630_v25, %v6396_v43 }
 0x20b   : > { %v2140_v16 = vrot.slane %v2126_v33, %v6396_v43  ;;  %v2141_v20 = vcombine.high %v2133_v52, %v2133_v52  ;;  %v2149_v48 = vrot.slane %v2133_v52, %v6396_v43  ;;  %v3727_v12 = vmul.f32 %v2125_v58, %v2125_v58 }
 0x20c   : > { %3658 = vst.msk [vmem:[%s6519_s11 + $0x20] sm:$0xff] %vm3245_vm3, %v3498_v44  ;;  %v6980_v22 = vrot.slane %v4614_v28, %v6396_v43  ;;  %v2650_v13 = vrot.slane %v2636_v36, %v6396_v43  ;;  %v6985_v30 = vmul.f32 %v6958_v35, %v6958_v35  ;;  %v4242_v46 = vsel %vm3245_vm3, %v3498_v44, 0.0 }
 0x20d   : > { %v2142_v53 = vcombine.high %v2140_v16, %v2140_v16  ;;  %v2156_v21 = vrot.slane %v2140_v16, %v6396_v43  ;;  %v2163_v6 = vrot.slane %v2141_v20, %v6396_v43  ;;  %v2171_v60 = vcombine.high %v2149_v48, %v2149_v48 }
 0x20e   : > { %v4629_v59 = vcombine.low %v6927_v5, %v6980_v22  ;;  %v3091_v39 = vcombine.low %v2125_v58, %v2149_v48  ;;  %v2651_v49 = vcombine.high %v2643_v10, %v2643_v10  ;;  %v3728_v24 = vmul.f32 %v2149_v48, %v2149_v48 }
 0x20f   : > { %v2170_v31 = vrot.slane %v2142_v53, %v6396_v43  ;;  %v2173_v34 = vcombine.high %v2163_v6, %v2163_v6  ;;  %v3092_v27 = vcombine.low %v2163_v6, %v2171_v60  ;;  %v2172_v57 = vcombine.high %v2156_v21, %v2156_v21 }
 0x210   : > { %v3107_v11 = vrot.slane %v3091_v39, %v6396_v43  ;;  %v3729_v18 = vmul.f32 %v2163_v6, %v2163_v6  ;;  %v3730_v61 = vmul.f32 %v2171_v60, %v2171_v60  ;;  %v2652_v19 = vcombine.high %v2650_v13, %v2650_v13 }
 0x211   : > { %v2174_v1 = vcombine.high %v2170_v31, %v2170_v31  ;;  %v3093_v3 = vcombine.low %v2173_v34, %v2156_v21  ;;  %v5166_v4 = vcombine.high %v2156_v21, %v2170_v31  ;;  %v3731_v2 = vmul.f32 %v2173_v34, %v2173_v34 }
 0x212   : > { %v3122_v54 = vcombine.low %v6933_v47, %v3107_v11  ;;  %v3732_v50 = vmul.f32 %v2156_v21, %v2156_v21  ;;  %v4059_v38 = vcombine.low %v3727_v12, %v3728_v24  ;;  %v3114_v40 = vrot.slane %v3092_v27, %v6396_v43 }
 0x213   : > { %v3121_v25 = vrot.slane %v3093_v3, %v6396_v43  ;;  %v3734_v8 = vmul.f32 %v2174_v1, %v2174_v1  ;;  %v4060_v58 = vcombine.low %v3729_v18, %v3730_v61  ;;  %v3733_v56 = vmul.f32 %v2172_v57, %v2172_v57 }
 0x214   : > { %v4061_v62 = vcombine.low %v3731_v2, %v3732_v50  ;;  %v4075_v63 = vrot.slane %v4059_v38, %v6396_v43  ;;  %v2659_v33 = vrot.slane %v2643_v10, %v6396_v43  ;;  %v7000_v44 = vrot.slane %v5166_v4, %v6396_v43 }
 0x215   : > { %v3123_v52 = vcombine.low %v3114_v40, %v3121_v25  ;;  %v4082_v47 = vrot.slane %v4060_v58, %v6396_v43  ;;  %v2666_v28 = vrot.slane %v2650_v13, %v6396_v43  ;;  %v2673_v20 = vrot.slane %v2651_v49, %v6396_v43 }
 0x216   : > { %v4089_v36 = vrot.slane %v4061_v62, %v6396_v43  ;;  %v4090_v16 = vcombine.low %v6961_v17, %v4075_v63  ;;  %v2680_v48 = vrot.slane %v2652_v19, %v6396_v43  ;;  %v3130_v12 = vrot.slane %v3122_v54, %v6396_v43 }
 0x217   : > { %v3137_v10 = vrot.slane %v3123_v52, %v6396_v43  ;;  %v4107_v53 = vcombine.low %v3733_v56, %v3734_v8  ;;  %v2681_v21 = vcombine.high %v2659_v33, %v2659_v33  ;;  %v2682_v39 = vcombine.high %v2666_v28, %v2666_v28 }
 0x218   : > { %v4091_v6 = vcombine.low %v4082_v47, %v4089_v36  ;;  %v4098_v60 = vrot.slane %v4090_v16, %v6396_v43  ;;  %v2683_v13 = vcombine.high %v2673_v20, %v2673_v20  ;;  %v2684_v34 = vcombine.high %v2680_v48, %v2680_v48 }
 0x219   : > { %v3138_v31 = vcombine.low %v3130_v12, %v3137_v10  ;;  %v3500_v17 = vcombine.low %v6958_v35, %v2659_v33  ;;  %v3501_v27 = vcombine.low %v2673_v20, %v2681_v21  ;;  %v5174_v57 = vcombine.high %v2666_v28, %v2680_v48 }
 0x21a   : > { %v4105_v49 = vrot.slane %v4091_v6, %v6396_v43  ;;  %v3502_v24 = vcombine.low %v2683_v13, %v2666_v28  ;;  %v4243_v11 = vadd.f32 %v4242_v46, %v6905_v32  ;;  %v4300_v3 = vmul.f32 %v2659_v33, %v2659_v33 }
 0x21b   : > { %3251 = vst.msk [vmem:[%s6476_s29 + $0x28] sm:$0xff] %vm3245_vm3, %v3138_v31  ;;  %v3671_v18 = vsel %vm3245_vm3, %v3138_v31, 0.0  ;;  %v3516_v61 = vrot.slane %v3500_v17, %v6396_v43  ;;  %v3523_v1 = vrot.slane %v3501_v27, %v6396_v43  ;;  %v4301_v54 = vmul.f32 %v2673_v20, %v2673_v20 }
 0x21c   : > { %v7020_v4 = vadd.f32 %v3671_v18, %v6953_v0  ;;  %v4106_v35 = vcombine.low %v4098_v60, %v4105_v49  ;;  %v3530_v19 = vrot.slane %v3502_v24, %v6396_v43  ;;  %v4302_v50 = vmul.f32 %v2681_v21, %v2681_v21 }
 0x21d   : > { %v3531_v2 = vcombine.low %v6964_v15, %v3516_v61  ;;  %v4303_v32 = vmul.f32 %v2683_v13, %v2683_v13  ;;  %v4304_v46 = vmul.f32 %v2666_v28, %v2666_v28  ;;  %v7025_v38 = vrot.slane %v4107_v53, %v6396_v43 }
 0x21e   : > { %v3532_v40 = vcombine.low %v3523_v1, %v3530_v19  ;;  %v4305_v25 = vmul.f32 %v2682_v39, %v2682_v39  ;;  %v4306_v8 = vmul.f32 %v2684_v34, %v2684_v34  ;;  %v7028_v58 = vrot.slane %v5174_v57, %v6396_v43 }
 0x21f   : > { %v4631_v0 = vcombine.low %v6985_v30, %v4300_v3  ;;  %v4632_v56 = vcombine.low %v4301_v54, %v4302_v50  ;;  %v4633_v62 = vcombine.low %v4303_v32, %v4304_v46  ;;  %v3539_v63 = vrot.slane %v3531_v2, %v6396_v43 }
 0x220   : > { %v3546_v15 = vrot.slane %v3532_v40, %v6396_v43  ;;  %v5581_v33 = vadd.f32 %v6549_v23, %v6392_v37  ;;  %v2685_v52 = vcombine.high %v6564_v45, %v6564_v45  ;;  %v4679_v30 = vcombine.low %v4305_v25, %v4306_v8 }
 0x221   : > { %v4647_v47 = vrot.slane %v4631_v0, %v6396_v43  ;;  %v4654_v28 = vrot.slane %v4632_v56, %v6396_v43  ;;  %v4661_v36 = vrot.slane %v4633_v62, %v6396_v43  ;;  %v7041_v16 = vsel %vm3245_vm3, %v4106_v35, 0.0 }
 0x222   : > { %v3547_v20 = vcombine.low %v3539_v63, %v3546_v15  ;;  %v2175_v48 = vcombine.high %v5581_v33, %v5581_v33  ;;  %v2182_v12 = vrot.slane %v5581_v33, %v6396_v43  ;;  %v2692_v23 = vrot.slane %v6564_v45, %v6396_v43 }
 0x223   : > { %v4662_v10 = vcombine.low %v6973_v26, %v4647_v47  ;;  %v4663_v37 = vcombine.low %v4654_v28, %v4661_v36  ;;  %v2699_v53 = vrot.slane %v2685_v52, %v6396_v43  ;;  %v7062_v45 = vrot.slane %v4679_v30, %v6396_v43 }
 0x224   : > { %3659 = vst.msk [vmem:[%s6519_s11 + $0x28] sm:$0xff] %vm3245_vm3, %v3547_v20  ;;  %v4244_v21 = vsel %vm3245_vm3, %v3547_v20, 0.0  ;;  %v2189_v6 = vrot.slane %v2175_v48, %v6396_v43  ;;  %v2190_v60 = vcombine.high %v2182_v12, %v2182_v12  ;;  %v2198_v39 = vrot.slane %v2182_v12, %v6396_v43 }
 0x225   : > { %v7053_v13 = vadd.f32 %v4244_v21, %v4243_v11  ;;  %v7056_v31 = vrot.slane %v4662_v10, %v6396_v43  ;;  %v7059_v26 = vrot.slane %v4663_v37, %v6396_v43  ;;  %v2700_v11 = vcombine.high %v2692_v23, %v2692_v23 }
 0x226   : > { %v2191_v34 = vcombine.high %v2189_v6, %v2189_v6  ;;  %v2205_v17 = vrot.slane %v2189_v6, %v6396_v43  ;;  %v2212_v27 = vrot.slane %v2190_v60, %v6396_v43  ;;  %v2220_v49 = vcombine.high %v2198_v39, %v2198_v39 }
 0x227   : > { %v4678_v24 = vcombine.low %v7056_v31, %v7059_v26  ;;  %v3735_v57 = vmul.f32 %v2198_v39, %v2198_v39  ;;  %v2701_v18 = vcombine.high %v2699_v53, %v2699_v53  ;;  %v2708_v2 = vrot.slane %v2692_v23, %v6396_v43 }
 0x228   : > { %v2219_v61 = vrot.slane %v2191_v34, %v6396_v43  ;;  %v2221_v1 = vcombine.high %v2212_v27, %v2212_v27  ;;  %v3140_v3 = vcombine.low %v2198_v39, %v2212_v27  ;;  %v5167_v35 = vcombine.high %v2198_v39, %v2212_v27 }
 0x229   : > { %v3736_v19 = vmul.f32 %v2212_v27, %v2212_v27  ;;  %v3737_v54 = vmul.f32 %v2220_v49, %v2220_v49  ;;  %v2715_v50 = vrot.slane %v2699_v53, %v6396_v43  ;;  %v3739_v25 = vmul.f32 %v2205_v17, %v2205_v17 }
 0x22a   : > { %v3142_v32 = vcombine.low %v2205_v17, %v2219_v61  ;;  %v3156_v46 = vrot.slane %v3140_v3, %v6396_v43  ;;  %v3738_v40 = vmul.f32 %v2221_v1, %v2221_v1  ;;  %v3740_v8 = vmul.f32 %v2219_v61, %v2219_v61 }
 0x22b   : > { %v4108_v0 = vcombine.low %v3735_v57, %v3736_v19  ;;  %v2722_v56 = vrot.slane %v2700_v11, %v6396_v43  ;;  %v2729_v62 = vrot.slane %v2701_v18, %v6396_v43  ;;  %v3163_v63 = vrot.slane %v5167_v35, %v6396_v43 }
 0x22c   : > { %v3170_v15 = vrot.slane %v3142_v32, %v6396_v43  ;;  %v3171_v33 = vcombine.low %v7000_v44, %v3156_v46  ;;  %v4109_v52 = vcombine.low %v3737_v54, %v3738_v40  ;;  %v4110_v47 = vcombine.low %v3739_v25, %v3740_v8 }
 0x22d   : > { %v4124_v28 = vrot.slane %v4108_v0, %v6396_v43  ;;  %v2730_v36 = vcombine.high %v2708_v2, %v2708_v2  ;;  %v3549_v30 = vcombine.low %v2708_v2, %v2722_v56  ;;  %v2731_v12 = vcombine.high %v2722_v56, %v2722_v56 }
 0x22e   : > { %v3172_v20 = vcombine.low %v3163_v63, %v3170_v15  ;;  %v4131_v48 = vrot.slane %v4109_v52, %v6396_v43  ;;  %v5175_v10 = vcombine.high %v2708_v2, %v2722_v56  ;;  %v4138_v37 = vrot.slane %v4110_v47, %v6396_v43 }
 0x22f   : > { %v4139_v23 = vcombine.low %v7025_v38, %v4124_v28  ;;  %v3551_v53 = vcombine.low %v2715_v50, %v2729_v62  ;;  %v3565_v21 = vrot.slane %v3549_v30, %v6396_v43  ;;  %v3179_v44 = vrot.slane %v3171_v33, %v6396_v43 }
 0x230   : > { %v3186_v6 = vrot.slane %v3172_v20, %v6396_v43  ;;  %v4307_v60 = vmul.f32 %v2708_v2, %v2708_v2  ;;  %v4308_v39 = vmul.f32 %v2722_v56, %v2722_v56  ;;  %v4140_v34 = vcombine.low %v4131_v48, %v4138_v37 }
 0x231   : > { %v3572_v17 = vrot.slane %v5175_v10, %v6396_v43  ;;  %v3579_v27 = vrot.slane %v3551_v53, %v6396_v43  ;;  %v3580_v49 = vcombine.low %v7028_v58, %v3565_v21  ;;  %v4309_v11 = vmul.f32 %v2730_v36, %v2730_v36 }
 0x232   : > { %v3187_v57 = vcombine.low %v3179_v44, %v3186_v6  ;;  %v4310_v38 = vmul.f32 %v2731_v12, %v2731_v12  ;;  %v4311_v18 = vmul.f32 %v2715_v50, %v2715_v50  ;;  %v7088_v1 = vrot.slane %v4139_v23, %v6396_v43 }
 0x233   : > { %v7091_v3 = vrot.slane %v4140_v34, %v6396_v43  ;;  %v3581_v35 = vcombine.low %v3572_v17, %v3579_v27  ;;  %v4312_v19 = vmul.f32 %v2729_v62, %v2729_v62  ;;  %v3588_v54 = vrot.slane %v3580_v49, %v6396_v43 }
 0x234   : > { %3252 = vst.msk [vmem:[%s6476_s29 + $0x30] sm:$0xff] %vm3245_vm3, %v3187_v57  ;;  %v4680_v2 = vcombine.low %v4307_v60, %v4308_v39  ;;  %v4681_v32 = vcombine.low %v4309_v11, %v4310_v38  ;;  %v5582_v58 = vadd.f32 %v6618_v14, %v6394_v41  ;;  %v2222_v25 = vcombine.high %v2219_v61, %v2219_v61 }
 0x235   : > { %v4155_v50 = vcombine.low %v7088_v1, %v7091_v3  ;;  %v3595_v46 = vrot.slane %v3581_v35, %v6396_v43  ;;  %v4682_v40 = vcombine.low %v4311_v18, %v4312_v19  ;;  %v7105_v15 = vsel %vm3245_vm3, %v3187_v57, 0.0 }
 0x236   : > { %v4696_v8 = vrot.slane %v4680_v2, %v6396_v43  ;;  %v4703_v0 = vrot.slane %v4681_v32, %v6396_v43  ;;  %v2223_v56 = vcombine.high %v5582_v58, %v5582_v58  ;;  %v2230_v63 = vrot.slane %v5582_v58, %v6396_v43 }
 0x237   : > { %v7107_v33 = vcombine.low %v3588_v54, %v3595_v46  ;;  %v4710_v41 = vrot.slane %v4682_v40, %v6396_v43  ;;  %v3741_v14 = vmul.f32 %v2222_v25, %v2222_v25  ;;  %v2732_v30 = vcombine.high %v2729_v62, %v2729_v62 }
 0x238   : > { %v4711_v52 = vcombine.low %v7062_v45, %v4696_v8  ;;  %v2237_v47 = vrot.slane %v2223_v56, %v6396_v43  ;;  %v2238_v61 = vcombine.high %v2230_v63, %v2230_v63  ;;  %v2246_v28 = vrot.slane %v2230_v63, %v6396_v43 }
 0x239   : > { %3660 = vst.msk [vmem:[%s6519_s11 + $0x30] sm:$0xff] %vm3245_vm3, %v7107_v33  ;;  %v4712_v36 = vcombine.low %v4703_v0, %v4710_v41  ;;  %v2733_v20 = vcombine.high %v6645_v55, %v6645_v55  ;;  %v2740_v48 = vrot.slane %v6645_v55, %v6396_v43  ;;  %v4792_v7 = vsel %vm3245_vm3, %v4629_v59, 0.0 }
 0x23a   : > { %v7121_v12 = vrot.slane %v4711_v52, %v6396_v43  ;;  %v2239_v45 = vcombine.high %v2237_v47, %v2237_v47  ;;  %v2253_v10 = vrot.slane %v2237_v47, %v6396_v43  ;;  %v2260_v37 = vrot.slane %v2238_v61, %v6396_v43 }
 0x23b   : > { %v7126_v23 = vrot.slane %v4712_v36, %v6396_v43  ;;  %v2268_v53 = vcombine.high %v2246_v28, %v2246_v28  ;;  %v3188_v21 = vcombine.low %v2222_v25, %v2246_v28  ;;  %v3742_v62 = vmul.f32 %v2246_v28, %v2246_v28 }
 0x23c   : > { %v2267_v44 = vrot.slane %v2239_v45, %v6396_v43  ;;  %v2269_v6 = vcombine.high %v2253_v10, %v2253_v10  ;;  %v2270_v60 = vcombine.high %v2260_v37, %v2260_v37  ;;  %v3743_v39 = vmul.f32 %v2260_v37, %v2260_v37 }
 0x23d   : > { %v4727_v55 = vcombine.low %v7121_v12, %v7126_v23  ;;  %v3189_v34 = vcombine.low %v2260_v37, %v2268_v53  ;;  %v3198_v17 = vrot.slane %v3188_v21, %v6396_v43  ;;  %v3744_v27 = vmul.f32 %v2268_v53, %v2268_v53 }
 0x23e   : > { %v3190_v49 = vcombine.low %v2270_v60, %v2253_v10  ;;  %v3191_v57 = vcombine.low %v2267_v44, %v2269_v6  ;;  %v3745_v11 = vmul.f32 %v2270_v60, %v2270_v60  ;;  %v3746_v38 = vmul.f32 %v2253_v10, %v2253_v10 }
 0x23f   : > { %v3205_v18 = vrot.slane %v3189_v34, %v6396_v43  ;;  %v3747_v35 = vmul.f32 %v2267_v44, %v2267_v44  ;;  %v3748_v19 = vmul.f32 %v2269_v6, %v2269_v6  ;;  %v4156_v54 = vcombine.low %v3741_v14, %v3742_v62 }
 0x240   : > { %v3212_v2 = vrot.slane %v3190_v49, %v6396_v43  ;;  %v3219_v32 = vrot.slane %v3191_v57, %v6396_v43  ;;  %v4157_v58 = vcombine.low %v3743_v39, %v3744_v27  ;;  %v4158_v46 = vcombine.low %v3745_v11, %v3746_v38 }
 0x241   : > { %v3220_v40 = vcombine.low %v3198_v17, %v3205_v18  ;;  %v4159_v25 = vcombine.low %v3747_v35, %v3748_v19  ;;  %v4166_v8 = vrot.slane %v4156_v54, %v6396_v43  ;;  %v2747_v0 = vrot.slane %v2733_v20, %v6396_v43 }
 0x242   : > { %v3221_v56 = vcombine.low %v3212_v2, %v3219_v32  ;;  %v4173_v63 = vrot.slane %v4157_v58, %v6396_v43  ;;  %v4180_v41 = vrot.slane %v4158_v46, %v6396_v43  ;;  %v2748_v52 = vcombine.high %v2740_v48, %v2740_v48 }
 0x243   : > { %v3228_v14 = vrot.slane %v3220_v40, %v6396_v43  ;;  %v4187_v47 = vrot.slane %v4159_v25, %v6396_v43  ;;  %v2749_v61 = vcombine.high %v2747_v0, %v2747_v0  ;;  %v2756_v28 = vrot.slane %v2740_v48, %v6396_v43 }
 0x244   : > { %v3235_v36 = vrot.slane %v3221_v56, %v6396_v43  ;;  %v4188_v45 = vcombine.low %v4166_v8, %v4173_v63  ;;  %v2763_v10 = vrot.slane %v2747_v0, %v6396_v43  ;;  %v2770_v20 = vrot.slane %v2748_v52, %v6396_v43 }
 0x245   : > { %v4189_v37 = vcombine.low %v4180_v41, %v4187_v47  ;;  %v2777_v53 = vrot.slane %v2749_v61, %v6396_v43  ;;  %v2778_v21 = vcombine.high %v2756_v28, %v2756_v28  ;;  %v3597_v62 = vcombine.low %v2732_v30, %v2756_v28 }
 0x246   : > { %v3236_v44 = vcombine.low %v3228_v14, %v3235_v36  ;;  %v4196_v6 = vrot.slane %v4188_v45, %v6396_v43  ;;  %v2779_v60 = vcombine.high %v2763_v10, %v2763_v10  ;;  %v2780_v39 = vcombine.high %v2770_v20, %v2770_v20 }
 0x247   : > { %v4203_v48 = vrot.slane %v4189_v37, %v6396_v43  ;;  %v3598_v34 = vcombine.low %v2770_v20, %v2778_v21  ;;  %v3607_v17 = vrot.slane %v3597_v62, %v6396_v43  ;;  %v4313_v27 = vmul.f32 %v2732_v30, %v2732_v30 }
 0x248   : > { %3253 = vst.msk [vmem:[%s6476_s29 + $0x38] sm:$0xff] %vm3245_vm3, %v3236_v44  ;;  %v3599_v49 = vcombine.low %v2780_v39, %v2763_v10  ;;  %v3600_v57 = vcombine.low %v2777_v53, %v2779_v60  ;;  %v4314_v11 = vmul.f32 %v2756_v28, %v2756_v28  ;;  %v4315_v38 = vmul.f32 %v2770_v20, %v2770_v20  ;;  %s7218_s29 = scalar_lea.hbm %s7291_s6, %s5178_s15 }
 0x249   : > { %v4204_v18 = vcombine.low %v4196_v6, %v4203_v48  ;;  %v3614_v35 = vrot.slane %v3598_v34, %v6396_v43  ;;  %v4316_v19 = vmul.f32 %v2778_v21, %v2778_v21  ;;  %v4317_v54 = vmul.f32 %v2780_v39, %v2780_v39 }
 0x24a   : > { %v3621_v2 = vrot.slane %v3599_v49, %v6396_v43  ;;  %v3628_v32 = vrot.slane %v3600_v57, %v6396_v43  ;;  %v4318_v58 = vmul.f32 %v2763_v10, %v2763_v10  ;;  %v4319_v46 = vmul.f32 %v2777_v53, %v2777_v53 }
 0x24b   : > { %v3629_v40 = vcombine.low %v3607_v17, %v3614_v35  ;;  %v4320_v25 = vmul.f32 %v2779_v60, %v2779_v60  ;;  %v4728_v30 = vcombine.low %v4313_v27, %v4314_v11  ;;  %v4729_v8 = vcombine.low %v4315_v38, %v4316_v19 }
 0x24c   : > { %v3630_v0 = vcombine.low %v3621_v2, %v3628_v32  ;;  %v4730_v56 = vcombine.low %v4317_v54, %v4318_v58  ;;  %v3674_v63 = vadd.f32 %v7105_v15, %v7020_v4  ;;  %v3675_v41 = vsel %vm3245_vm3, %v3236_v44, 0.0 }
 0x24d   : > { %v4246_v52 = vsel %vm3245_vm3, %v7107_v33, 0.0  ;;  %v4731_v14 = vcombine.low %v4319_v46, %v4320_v25  ;;  %v4738_v47 = vrot.slane %v4728_v30, %v6396_v43  ;;  %v4745_v61 = vrot.slane %v4729_v8, %v6396_v43 }
 0x24e   : > { %v3637_v28 = vrot.slane %v3629_v40, %v6396_v43  ;;  %v3644_v36 = vrot.slane %v3630_v0, %v6396_v43  ;;  %v4752_v45 = vrot.slane %v4730_v56, %v6396_v43  ;;  %v3676_v10 = vadd.f32 %v3675_v41, %v3674_v63 }
 0x24f   : > { %v4794_v4 = vsel %vm3245_vm3, %v4678_v24, 0.0  ;;  %v4759_v15 = vrot.slane %v4731_v14, %v6396_v43  ;;  %v4760_v33 = vcombine.low %v4738_v47, %v4745_v61  ;;  %v4220_v20 = vsel %vm3245_vm3, %v4057_v29, 0.0 }
 0x250   : > { %v3645_v37 = vcombine.low %v3637_v28, %v3644_v36  ;;  %v3677_v53 = vrot.slane %v3676_v10, 4  ;;  %v4221_v21 = vadd.f32 %v4220_v20, %v6887_v51  ;;  %v4224_v62 = vsel %vm3245_vm3, %v4155_v50, 0.0 }
 0x251   : > { %v4761_v31 = vcombine.low %v4752_v45, %v4759_v15  ;;  %v4226_v26 = vsel %vm3245_vm3, %v4204_v18, 0.0  ;;  %v4247_v24 = vadd.f32 %v4246_v52, %v7053_v13  ;;  %v4793_v1 = vadd.f32 %v4792_v7, %v6922_v9 }
 0x252   : > { %3661 = vst.msk [vmem:[%s6519_s11 + $0x38] sm:$0xff] %vm3245_vm3, %v3645_v37  ;;  %v3678_v42 = vadd.f32 %v3677_v53, %v3676_v10  ;;  %v4223_v51 = vadd.f32 %v7041_v16, %v4221_v21  ;;  %v4248_v29 = vsel %vm3245_vm3, %v3645_v37, 0.0  ;;  %v4768_v3 = vrot.slane %v4760_v33, %v6396_v43  ;;  %s5856_s11 = smov [#allocation2]  }
 0x253   : > { %v4775_v50 = vrot.slane %v4761_v31, %v6396_v43  ;;  %v4249_v44 = vadd.f32 %v4248_v29, %v4247_v24  ;;  %v4796_v5 = vsel %vm3245_vm3, %v4727_v55, 0.0  ;;  %v4795_v13 = vadd.f32 %v4794_v4, %v4793_v1  ;;  %s5761_s12 = sshll.u32 %s5856_s11, 4  ;;  %s5762_s12 = int_to_ptr.vmem [resolvable:$false] %s5761_s12 }
 0x254   : > { %v3679_v22 = vrot.slane %v3678_v42, 2  ;;  %v4225_v59 = vadd.f32 %v4224_v62, %v4223_v51  ;;  %s5763_s20 = scalar_lea.vmem %s5762_s12, 64  ;;  %p5764_p0 = scmp.lt.s32.totalorder %s7212_s16, %s5762_s12 }
 0x255   : > { %v4776_v6 = vcombine.low %v4768_v3, %v4775_v50  ;;  %v4250_v16 = vrot.slane %v4249_v44, 4  ;;  %v4797_v39 = vadd.f32 %v4796_v5, %v4795_v13  ;;  %p5765_p1 = scmp.lt.s32.totalorder %s5763_s20, %s5757_s10 }
 0x256   : > { %v3680_v60 = vadd.f32 %v3679_v22, %v3678_v42  ;;  %v4227_v9 = vadd.f32 %v4226_v26, %v4225_v59 }
 0x257   : > { %v4251_v48 = vadd.f32 %v4250_v16, %v4249_v44  ;;  %v4798_v43 = vsel %vm3245_vm3, %v4776_v6, 0.0  ;;  %p5766_p2 = por %p5765_p1, %p5764_p0 }
 0x258   : > { %v3681_v34 = vrot.slane %v3680_v60, 1  ;;  %v4228_v12 = vrot.slane %v4227_v9, 4  ;;  %v4799_v23 = vadd.f32 %v4798_v43, %v4797_v39 }
 0x259   : > { %v4252_v55 = vrot.slane %v4251_v48, 2  ;;  %p5767_p3 = pnand %p5766_p2, %p5760_p13 }
 0x25a   : > { %v3682_v17 = vadd.f32 %v3681_v34, %v3680_v60  ;;  %v4229_v27 = vadd.f32 %v4228_v12, %v4227_v9  ;;  %v4800_v49 = vrot.slane %v4799_v23, 4 }
 0x25b   : > { %v4253_v57 = vadd.f32 %v4252_v55, %v4251_v48 }
 0x25c   : > { %3684 = vst.msk [vmem:[%s262_s14] sm:$0x1] %vm3683_vm4, %v3682_v17  ;;  %v4230_v11 = vrot.slane %v4229_v27, 2  ;;  %v4801_v38 = vadd.f32 %v4800_v49, %v4799_v23 }
 0x25d   : > { %v4254_v18 = vrot.slane %v4253_v57, 1 }
 0x25e   : > { %v4231_v35 = vadd.f32 %v4230_v11, %v4229_v27  ;;  %v4802_v19 = vrot.slane %v4801_v38, 2 }
 0x25f   : > { %v4255_v54 = vadd.f32 %v4254_v18, %v4253_v57 }
 0x260   : > { %v4232_v2 = vrot.slane %v4231_v35, 1  ;;  %v4803_v32 = vadd.f32 %v4802_v19, %v4801_v38 }
 0x261   : > { %4256 = vst.msk [vmem:[%s7202_s18] sm:$0x1] %vm3683_vm4, %v4255_v54 }
 0x262   : > { %v4233_v58 = vadd.f32 %v4232_v2, %v4231_v35  ;;  %v4804_v46 = vrot.slane %v4803_v32, 1 }
 0x264   : > { %4234 = vst.msk [vmem:[%s262_s14 + $0x1] sm:$0x1] %vm3683_vm4, %v4233_v58  ;;  %v4805_v40 = vadd.f32 %v4804_v46, %v4803_v32 }
 0x265   : > { %5770 = shalt.err (!%p5767_p3)
}
 0x266   : > { %s5771_s14 = scalar_lea.hbm %s7210_s26, 32  ;;  %s5775_s25 = scalar_lea.hbm %s7290_s5, 64 }
 0x267   : > { %p5772_p4 = scmp.ne.s32.totalorder %s7210_s26, %s5771_s14  ;;  %p5776_p9 = scmp.lt.u32.totalorder %s7210_s26, %s7290_s5 }
 0x268   : > { %p5777_p10 = scmp.lt.u32.totalorder %s5775_s25, %s5771_s14  ;;  %p5779_p12 = scmp.lt.u32.totalorder %s5771_s14, %s7210_s26 }
 0x269   : > { %p5773_p7 = pnand %p5772_p4, %p5931_p5 }
 0x26a   : > { %p5778_p11 = por %p5777_p10, %p5776_p9 }
 0x26b   : > { %p5774_p8 = pneg %p5773_p7 }
 0x26c   : > { %p5780_p13 = por %p5779_p12, %p5778_p11 }
 0x26e   : > { %p5781_p0 = pnand %p5780_p13, %p5774_p8 }
 0x270   : > { %5784 = shalt.err (!%p5781_p0)
}
 0x271   : > { %5710 = dma.vmem_to_hbm [thread:$0]  (%p5931_p5), %s7212_s16, 32, %s7210_s26, %s4818_s9   ;;  %4806 = vst.msk [vmem:[%s7202_s18 + $0x1] sm:$0x1] %vm3683_vm4, %v4805_v40 }
 0x272   : > { %s4823_s10 = scalar_lea.sflag [#allocation5], %s7196_s13  ;;  %s5785_s12 = scalar_lea.vmem %s7220_s19, 32 }
 0x273   : > { %p5786_p1 = scmp.ne.s32.totalorder %s7220_s19, %s5785_s12  ;;  %s5857_s20 = smov [#allocation4]  }
 0x274   : > { %s5789_s14 = sshll.u32 %s5857_s20, 4  ;;  %s5790_s14 = int_to_ptr.vmem [resolvable:$false] %s5789_s14 }
 0x275   : > { %p5787_p2 = pnand %p5786_p1, %p5931_p5  ;;  %s5791_s15 = scalar_lea.vmem %s5790_s14, 64 }
 0x276   : > { %p5792_p4 = scmp.lt.s32.totalorder %s7220_s19, %s5790_s14  ;;  %p5793_p7 = scmp.lt.s32.totalorder %s5791_s15, %s5785_s12 }
 0x277   : > { %p5788_p3 = pneg %p5787_p2 }
 0x278   : > { %p5794_p8 = por %p5793_p7, %p5792_p4 }
 0x27a   : > { %p5795_p9 = pnand %p5794_p8, %p5788_p3 }
 0x27c   : > { %5798 = shalt.err (!%p5795_p9)
}
 0x27d   : > { %s5799_s13 = scalar_lea.hbm %s7218_s29, 32  ;;  %s5803_s26 = scalar_lea.hbm %s7291_s6, 64 }
 0x27e   : > { %p5800_p10 = scmp.ne.s32.totalorder %s7218_s29, %s5799_s13  ;;  %p5804_p13 = scmp.lt.u32.totalorder %s7218_s29, %s7291_s6 }
 0x27f   : > { %p5805_p0 = scmp.lt.u32.totalorder %s5803_s26, %s5799_s13  ;;  %p5807_p2 = scmp.lt.u32.totalorder %s5799_s13, %s7218_s29 }
 0x280   : > { %p5801_p11 = pnand %p5800_p10, %p5931_p5 }
 0x281   : > { %p5806_p1 = por %p5805_p0, %p5804_p13 }
 0x282   : > { %p5802_p12 = pneg %p5801_p11 }
 0x283   : > { %p5808_p3 = por %p5807_p2, %p5806_p1 }
 0x285   : > { %p5809_p4 = pnand %p5808_p3, %p5802_p12 }
 0x287   : > { %5812 = shalt.err (!%p5809_p4)
}
 0x288   : > { %5711 = dma.vmem_to_hbm [thread:$0]  (%p5931_p5), %s7220_s19, 32, %s7218_s29, %s4823_s10  }
 0x289 PF: > { %p5721_p7 = scmp.ge.s32.totalorder %s5851_s24, 2  ;;  %s4883_s25 = sand.u32 1, %s5839_s21  }
 0x28a   : > { %s4884_s28 = scalar_lea.sflag [#allocation3], %s4883_s25 }
 0x28b   : > { %p5715_p8 = pnand %p5721_p7, %p5935_p6 }
 0x28d   : > { %5830 = dma.done.wait (!%p5715_p8), %s4884_s28, 32  }
 0x28e   : > { %5832 = vsyncadd (!%p5715_p8), %s4884_s28, 4294967264  ;;  %s4893_s11 = scalar_lea.sflag [#allocation5], %s4883_s25 }
 0x28f   : > { %5834 = dma.done.wait (!%p5715_p8), %s4893_s11, 32  }
 0x290   : > { %5836 = vsyncadd (!%p5715_p8), %s4893_s11, 4294967264  ;;  %p20_p5 = scmp.ge.s32.totalorder %s5918_s27, 4   ;;  %s7294_s21 = smov %s5843_s22 }
 0x291   : > { %s7295_s22 = smov %s5847_s23  ;;  %s7296_s23 = smov %s5929_s30 }
 0x292   : > { %s7297_s24 = smov %s5918_s27  ;;  %22 = sbr.rel (!%p20_p5) target bundleno = 5 (0x5), region = 119 }
 0x299   :  { %4898 = vsyncpa [#allocation3], 1 }
 0x29a   :  { %4900 = vsyncpa [#allocation3 + $0x1], 1 }
 0x29b   :  { %4901 = vsyncpa [#allocation5], 1 }
 0x29c   :  { %4903 = vsyncpa [#allocation5 + $0x1], 1 }

</bundles_post_ra>
